<compile_context>
chip_gen: v7x
topology: tpu7x:2x2x1
jax: 0.10.0
libtpu: 0.0.40
codegen_flags: <defaults>
</compile_context>

<pallas_src>
import functools

import jax
import jax.numpy as jnp
from jax.experimental import pallas as pl
from jax.experimental.pallas import tpu as pltpu


def _round_up(x, m):
    return (x + m - 1) // m * m


def _vmem_cap_bytes():
    try:
        return int(pltpu.get_tpu_info().vmem_capacity_bytes)
    except Exception:
        return 64 << 20          # conservative (v7x per-TC capacity)


def _decoder_kernel(ids_ref,                          # (Bp,) int32, scalar prefetch (SMEM)
                    emb_hbm,                          # (V, Hp)   f32, HBM (pl.ANY)
                    enc_ref, h_ref,                   # (Bp, Hp)  f32, resident
                    wce_ref, wcx_ref, bcomb_ref,      # (Hp, Hp) bf16 x2 / (1, Hp) f32
                    wih_ref, bi_ref,                  # (Hp, 3Hp) bf16 / (1, 3Hp) f32
                    whh_ref, bh_ref,                  # (Hp, 3Hp) bf16 / (1, 3Hp) f32
                    wo_ref, bo_ref,                   # (Hp, TV)  bf16 / (1, TV)  f32
                    logp_ref, hnew_ref,               # (Bp, Vp) f32 / (Bp, Hp) f32 (resident)
                    emb_buf, hb_scr, m_scr, l_scr, dma_sem,
                    *, Bp, Hp, tile_v, nv):
    f32 = jnp.float32
    bf16 = jnp.bfloat16
    j = pl.program_id(0)

    @pl.when(j == 0)
    def _embed_and_gru():
        # ---- embedding gather: issue Bp row DMAs (ids read from SMEM once, before any wait)
        ids = [ids_ref[b] for b in range(Bp)]
        copies = [pltpu.make_async_copy(emb_hbm.at[pl.ds(ids[b], 1)],
                                        emb_buf.at[pl.ds(b, 1)],
                                        dma_sem.at[b]) for b in range(Bp)]
        for cp in copies:
            cp.start()

        # ---- hidden-side GRU matmul overlaps with the in-flight gather DMAs ----
        h = h_ref[...]
        gh = jnp.dot(h.astype(bf16), whh_ref[...], preferred_element_type=f32) + bh_ref[...]

        for cp in copies:
            cp.wait()
        # TODO(synk): nn.Dropout(p=0.1) on `embedded` is stochastic; identity (eval mode).

        # ---- comb: Linear(2H -> H) as two K=Hp dots (no lane-axis concat temp) ----
        emb = emb_buf[...].astype(bf16)
        x = (jnp.dot(emb, wce_ref[...], preferred_element_type=f32)
             + jnp.dot(enc_ref[...].astype(bf16), wcx_ref[...], preferred_element_type=f32)
             + bcomb_ref[...])

        # ---- GRUCell; gates packed along lanes as [r | z | n] ----
        #   b_i = [b_ir+b_hr, b_iz+b_hz, b_in],  b_h = [0, 0, b_hn]  (pre-summed at pack time)
        gi = jnp.dot(x.astype(bf16), wih_ref[...], preferred_element_type=f32) + bi_ref[...]
        r = jax.nn.sigmoid(gi[:, :Hp] + gh[:, :Hp])
        z = jax.nn.sigmoid(gi[:, Hp:2 * Hp] + gh[:, Hp:2 * Hp])
        n = jnp.tanh(gi[:, 2 * Hp:] + r * gh[:, 2 * Hp:])
        h_new = (1.0 - z) * n + z * h

        hnew_ref[...] = h_new
        hb_scr[...] = h_new.astype(bf16)
        m_scr[...] = jnp.full((Bp, 1), -jnp.inf, f32)
        l_scr[...] = jnp.zeros((Bp, 1), f32)

    # ---- output projection: one vocab tile per grid step, written straight into the
    #      resident output; online log-sum-exp in tiny VMEM scratch ----
    logits = jnp.dot(hb_scr[...], wo_ref[...], preferred_element_type=f32) + bo_ref[...]
    v0 = pl.multiple_of(j * tile_v, tile_v)
    logp_ref[:, pl.ds(v0, tile_v)] = logits

    m_prev = m_scr[...]
    m_new = jnp.maximum(m_prev, jnp.max(logits, axis=-1, keepdims=True))
    l_scr[...] = (l_scr[...] * jnp.exp(m_prev - m_new)
                  + jnp.sum(jnp.exp(logits - m_new), axis=-1, keepdims=True))
    m_scr[...] = m_new

    @pl.when(j == nv - 1)
    def _finalize_log_softmax():
        lse = m_scr[...] + jnp.log(l_scr[...])            # (Bp, 1)
        logp_ref[...] = logp_ref[...] - lse               # single in-place broadcast-subtract


def pack_params(params, tile_v=4096):
    """One-time packing: transpose/split/pad weights, pre-sum biases, cast to bf16."""
    f32, bf16 = jnp.float32, jnp.bfloat16
    H = int(params["comb_b"].shape[0])
    V = int(params["out_b"].shape[0])
    Hp = _round_up(H, 128)
    tv = tile_v if V >= tile_v else _round_up(V, 128)
    Vp = _round_up(V, tv)

    def pad2(w, rows, cols):
        w = jnp.asarray(w, f32)
        return jnp.pad(w, ((0, rows - w.shape[0]), (0, cols - w.shape[1])))

    def pad1(b, n):
        b = jnp.asarray(b, f32)
        return jnp.pad(b, (0, n - b.shape[0]))

    # embedding: rows gathered by index inside the kernel; keep f32 (tiny traffic).
    emb = pad2(params["embedding"], V, Hp)

    cw = params["comb_w"]                                       # torch Linear: (H, 2H)
    w_comb_emb = pad2(cw[:, :H].T, Hp, Hp).astype(bf16)         # x @ W layout, emb half
    w_comb_enc = pad2(cw[:, H:].T, Hp, Hp).astype(bf16)         # enc half
    b_comb = pad1(params["comb_b"], Hp)[None, :]

    wih, bih = params["gru_w_ih"], params["gru_b_ih"]           # (3H, H), (3H,)
    whh, bhh = params["gru_w_hh"], params["gru_b_hh"]

    def pack_gates(w):                                          # -> (Hp, 3Hp), x @ W layout
        return jnp.concatenate([pad2(w[g * H:(g + 1) * H, :].T, Hp, Hp)
                                for g in range(3)], axis=1)

    w_ih = pack_gates(wih).astype(bf16)
    w_hh = pack_gates(whh).astype(bf16)
    b_i = jnp.concatenate([pad1(bih[:H] + bhh[:H], Hp),
                           pad1(bih[H:2 * H] + bhh[H:2 * H], Hp),
                           pad1(bih[2 * H:], Hp)])[None, :]
    b_h = jnp.concatenate([jnp.zeros((2 * Hp,), f32),
                           pad1(bhh[2 * H:], Hp)])[None, :]

    wo = pad2(params["out_w"].T, Hp, Vp).astype(bf16)           # (Hp, Vp)
    bo = jnp.full((Vp,), -1e30, f32).at[:V].set(jnp.asarray(params["out_b"], f32))[None, :]

    return {"emb": emb, "w_comb_emb": w_comb_emb, "w_comb_enc": w_comb_enc, "b_comb": b_comb,
            "w_ih": w_ih, "b_i": b_i, "w_hh": w_hh, "b_h": b_h,
            "wo": wo, "bo": bo,
            "H": H, "V": V, "Hp": Hp, "Vp": Vp, "tile_v": tv}


def decoder_forward(input_ids, hidden, encoder_output, packed):
    """Fused Decoder.forward. Returns (log_probs (B,V), new_hidden (B,H), None)."""
    H, V = packed["H"], packed["V"]
    Hp, Vp, tile_v = packed["Hp"], packed["Vp"], packed["tile_v"]
    nv = Vp // tile_v
    B = input_ids.shape[0]
    Bp = _round_up(max(B, 8), 8)

    # cheap per-step activation padding (weights were padded once in pack_params)
    ids_p = jnp.pad(input_ids.astype(jnp.int32), (0, Bp - B))
    h_p = jnp.pad(hidden.astype(jnp.float32), ((0, Bp - B), (0, Hp - H)))
    enc_p = jnp.pad(encoder_output.astype(jnp.float32), ((0, Bp - B), (0, Hp - H)))

    kernel = functools.partial(_decoder_kernel, Bp=Bp, Hp=Hp, tile_v=tile_v, nv=nv)

    def resident(block_shape):
        return pl.BlockSpec(block_shape, lambda j, ids: (0, 0))

    grid_spec = pltpu.PrefetchScalarGridSpec(
        num_scalar_prefetch=1,
        grid=(nv,),
        in_specs=[
            pl.BlockSpec(memory_space=pl.ANY),                    # embedding table (HBM)
            resident((Bp, Hp)),                                   # encoder_output
            resident((Bp, Hp)),                                   # hidden
            resident((Hp, Hp)),                                   # comb weight, emb half
            resident((Hp, Hp)),                                   # comb weight, enc half
            resident((1, Hp)),                                    # comb bias
            resident((Hp, 3 * Hp)),                               # GRU W_ih (packed r|z|n)
            resident((1, 3 * Hp)),                                # GRU input-side bias
            resident((Hp, 3 * Hp)),                               # GRU W_hh (packed r|z|n)
            resident((1, 3 * Hp)),                                # GRU hidden-side bias
            pl.BlockSpec((Hp, tile_v), lambda j, ids: (0, j)),    # out-proj weight tile
            pl.BlockSpec((1, tile_v), lambda j, ids: (0, j)),     # out-proj bias tile
        ],
        out_specs=(
            resident((Bp, Vp)),                                   # log_probs (VMEM resident)
            resident((Bp, Hp)),                                   # new hidden
        ),
        scratch_shapes=[
            pltpu.VMEM((Bp, Hp), jnp.float32),                    # gathered embedding rows
            pltpu.VMEM((Bp, Hp), jnp.bfloat16),                   # h_new (bf16 matmul operand)
            pltpu.VMEM((Bp, 1), jnp.float32),                     # running max
            pltpu.VMEM((Bp, 1), jnp.float32),                     # running sum-exp
            pltpu.SemaphoreType.DMA((Bp,)),
        ],
    )

    # VMEM budget: residents x1, streamed wo/bo x2, outputs x1, scratch, + headroom;
    # clamped to per-generation capacity minus margin (critical on v7x's 64 MiB).
    resident_in = (2 * Bp * Hp * 4
                   + (2 * Hp * Hp + 2 * Hp * 3 * Hp) * 2
                   + (Hp + 2 * 3 * Hp) * 4)
    streamed = 2 * (Hp * tile_v * 2 + tile_v * 4)
    out_bytes = Bp * Vp * 4 + Bp * Hp * 4
    scratch_bytes = Bp * Hp * 4 + Bp * Hp * 2 + 2 * Bp * 4
    est = resident_in + streamed + out_bytes + scratch_bytes + (4 << 20)
    cap = max(_vmem_cap_bytes() - (16 << 20), 32 << 20)
    vmem_limit = int(min(cap, max(est, 32 << 20)))

    log_probs, new_hidden = pl.pallas_call(
        kernel,
        grid_spec=grid_spec,
        out_shape=(jax.ShapeDtypeStruct((Bp, Vp), jnp.float32),
                   jax.ShapeDtypeStruct((Bp, Hp), jnp.float32)),
        # donate the padded hidden buffer to the new-hidden output (decode-loop friendly)
        input_output_aliases={3: 1},
        compiler_params=pltpu.CompilerParams(
            dimension_semantics=("arbitrary",),        # vocab axis carries the lse reduction
            vmem_limit_bytes=vmem_limit),
    )(ids_p, packed["emb"], enc_p, h_p,
      packed["w_comb_emb"], packed["w_comb_enc"], packed["b_comb"],
      packed["w_ih"], packed["b_i"], packed["w_hh"], packed["b_h"],
      packed["wo"], packed["bo"])

    return log_probs[:B, :V], new_hidden[:B, :H], None


def _init_params(key, hidden_size, output_size):
    ks = jax.random.split(key, 9)
    H, V = hidden_size, output_size
    bound_comb = 1.0 / jnp.sqrt(2.0 * H)
    bound_gru = 1.0 / jnp.sqrt(1.0 * H)
    bound_out = 1.0 / jnp.sqrt(1.0 * H)
    u = lambda k, shape, b: jax.random.uniform(k, shape, jnp.float32, -b, b)
    return {
        "embedding": jax.random.normal(ks[0], (V, H), jnp.float32),
        "comb_w": u(ks[1], (H, 2 * H), bound_comb),
        "comb_b": u(ks[2], (H,), bound_comb),
        "gru_w_ih": u(ks[3], (3 * H, H), bound_gru),
        "gru_b_ih": u(ks[4], (3 * H,), bound_gru),
        "gru_w_hh": u(ks[5], (3 * H, H), bound_gru),
        "gru_b_hh": u(ks[6], (3 * H,), bound_gru),
        "out_w": u(ks[7], (V, H), bound_out),
        "out_b": u(ks[8], (V,), bound_out),
    }


def _reference_forward(input_ids, hidden, encoder_output, params):
    """Pure-JAX f32 reference mirroring the PyTorch forward (eval mode)."""
    H = hidden.shape[1]
    emb = jnp.take(params["embedding"], input_ids, axis=0)
    x = jnp.concatenate([emb, encoder_output], axis=1) @ params["comb_w"].T + params["comb_b"]
    gi = x @ params["gru_w_ih"].T + params["gru_b_ih"]
    gh = hidden @ params["gru_w_hh"].T + params["gru_b_hh"]
    r = jax.nn.sigmoid(gi[:, :H] + gh[:, :H])
    z = jax.nn.sigmoid(gi[:, H:2 * H] + gh[:, H:2 * H])
    n = jnp.tanh(gi[:, 2 * H:] + r * gh[:, 2 * H:])
    h_new = (1.0 - z) * n + z * hidden
    logits = h_new @ params["out_w"].T + params["out_b"]
    return jax.nn.log_softmax(logits, axis=1), h_new


if __name__ == "__main__":
    B, H, V = 4, 32, 16
    key = jax.random.PRNGKey(0)
    k_param, k_in, k_h, k_enc = jax.random.split(key, 4)

    params = _init_params(k_param, H, V)
    packed = pack_params(params)          # one-time weight packing (not per decode step)

    input_ids = jax.random.randint(k_in, (B,), 0, V, dtype=jnp.int32)
    hidden = jax.random.normal(k_h, (B, H), jnp.float32)
    encoder_output = jax.random.normal(k_enc, (B, H), jnp.float32)

    fwd = jax.jit(functools.partial(decoder_forward, packed=packed))
    log_probs, new_hidden, attn = fwd(input_ids, hidden, encoder_output)
    jax.block_until_ready((log_probs, new_hidden))

    ref_lp, ref_h = _reference_forward(input_ids, hidden, encoder_output, params)
    assert attn is None
    assert log_probs.shape == (B, V) and new_hidden.shape == (B, H)
    # bf16 weight streaming (f32 accumulation) vs. f32 reference -> loose tolerance.
    assert jnp.allclose(log_probs, ref_lp, atol=5e-2, rtol=5e-2)
    assert jnp.allclose(new_hidden, ref_h, atol=5e-2, rtol=5e-2)
    print("KERNEL_OK")
</pallas_src>

<mosaic_0001>
module attributes {stable_mosaic.version = 11 : i64} {
  func.func @_decoder_kernel(%arg0: i32, %arg1: memref<8xi32, #tpu.memory_space<smem>>, %arg2: memref<16x128xf32, #tpu.memory_space<any>>, %arg3: memref<8x128xf32, #tpu.memory_space<vmem>>, %arg4: memref<8x128xf32, #tpu.memory_space<vmem>>, %arg5: memref<128x128xbf16, #tpu.memory_space<vmem>>, %arg6: memref<128x128xbf16, #tpu.memory_space<vmem>>, %arg7: memref<1x128xf32, #tpu.memory_space<vmem>>, %arg8: memref<128x384xbf16, #tpu.memory_space<vmem>>, %arg9: memref<1x384xf32, #tpu.memory_space<vmem>>, %arg10: memref<128x384xbf16, #tpu.memory_space<vmem>>, %arg11: memref<1x384xf32, #tpu.memory_space<vmem>>, %arg12: memref<128x128xbf16, #tpu.memory_space<vmem>>, %arg13: memref<1x128xf32, #tpu.memory_space<vmem>>, %arg14: memref<8x128xf32, #tpu.memory_space<vmem>>, %arg15: memref<8x128xf32, #tpu.memory_space<vmem>>, %arg16: memref<8x128xf32, #tpu.memory_space<vmem>>, %arg17: memref<8x128xbf16, #tpu.memory_space<vmem>>, %arg18: memref<8x1xf32, #tpu.memory_space<vmem>>, %arg19: memref<8x1xf32, #tpu.memory_space<vmem>>, %arg20: memref<8x!tpu.dma_semaphore, #tpu.memory_space<semaphore_mem>>) attributes {dimension_semantics = [#tpu.dimension_semantics<arbitrary>], iteration_bounds = array<i64: 1>, scalar_prefetch = 1 : i64, scratch_operands = 5 : i64, tpu.core_type = #tpu.core_type<tc>, window_params = [{}, {pipeline_mode = #tpu.pipeline_mode<synchronous>, transform_indices = @transform_1, window_bounds = array<i64: 8, 128>}, {pipeline_mode = #tpu.pipeline_mode<synchronous>, transform_indices = @transform_2, window_bounds = array<i64: 8, 128>}, {pipeline_mode = #tpu.pipeline_mode<synchronous>, transform_indices = @transform_3, window_bounds = array<i64: 128, 128>}, {pipeline_mode = #tpu.pipeline_mode<synchronous>, transform_indices = @transform_4, window_bounds = array<i64: 128, 128>}, {pipeline_mode = #tpu.pipeline_mode<synchronous>, transform_indices = @transform_5, window_bounds = array<i64: 1, 128>}, {pipeline_mode = #tpu.pipeline_mode<synchronous>, transform_indices = @transform_6, window_bounds = array<i64: 128, 384>}, {pipeline_mode = #tpu.pipeline_mode<synchronous>, transform_indices = @transform_7, window_bounds = array<i64: 1, 384>}, {pipeline_mode = #tpu.pipeline_mode<synchronous>, transform_indices = @transform_8, window_bounds = array<i64: 128, 384>}, {pipeline_mode = #tpu.pipeline_mode<synchronous>, transform_indices = @transform_9, window_bounds = array<i64: 1, 384>}, {transform_indices = @transform_10, window_bounds = array<i64: 128, 128>}, {transform_indices = @transform_11, window_bounds = array<i64: 1, 128>}, {pipeline_mode = #tpu.pipeline_mode<synchronous>, transform_indices = @transform_12, window_bounds = array<i64: 8, 128>}, {pipeline_mode = #tpu.pipeline_mode<synchronous>, transform_indices = @transform_13, window_bounds = array<i64: 8, 128>}]} {
    %c0_i32 = arith.constant 0 : i32
    %0 = arith.cmpi eq, %arg0, %c0_i32 : i32
    %1 = arith.extui %0 : i1 to i32
    %c0_i32_0 = arith.constant 0 : i32
    %2 = arith.cmpi ne, %1, %c0_i32_0 : i32
    scf.if %2 {
      %c0_19 = arith.constant 0 : index
      %32 = memref.load %arg1[%c0_19] : memref<8xi32, #tpu.memory_space<smem>>
      %c1 = arith.constant 1 : index
      %33 = memref.load %arg1[%c1] : memref<8xi32, #tpu.memory_space<smem>>
      %c2 = arith.constant 2 : index
      %34 = memref.load %arg1[%c2] : memref<8xi32, #tpu.memory_space<smem>>
      %c3 = arith.constant 3 : index
      %35 = memref.load %arg1[%c3] : memref<8xi32, #tpu.memory_space<smem>>
      %c4 = arith.constant 4 : index
      %36 = memref.load %arg1[%c4] : memref<8xi32, #tpu.memory_space<smem>>
      %c5 = arith.constant 5 : index
      %37 = memref.load %arg1[%c5] : memref<8xi32, #tpu.memory_space<smem>>
      %c6 = arith.constant 6 : index
      %38 = memref.load %arg1[%c6] : memref<8xi32, #tpu.memory_space<smem>>
      %c7 = arith.constant 7 : index
      %39 = memref.load %arg1[%c7] : memref<8xi32, #tpu.memory_space<smem>>
      %c0_i32_20 = arith.constant 0 : i32
      %c0_i32_21 = arith.constant 0 : i32
      %40 = tpu.memref_slice %arg2[%32, %c0_i32_21] : memref<16x128xf32, #tpu.memory_space<any>> -> memref<1x128xf32, #tpu.memory_space<any>>
      %c0_i32_22 = arith.constant 0 : i32
      %c0_i32_23 = arith.constant 0 : i32
      %41 = tpu.memref_slice %arg16[%c0_i32_22, %c0_i32_23] : memref<8x128xf32, #tpu.memory_space<vmem>> -> memref<1x128xf32, #tpu.memory_space<vmem>>
      %42 = tpu.memref_slice %arg20[%c0_i32_20] : memref<8x!tpu.dma_semaphore, #tpu.memory_space<semaphore_mem>> -> memref<1x!tpu.dma_semaphore, #tpu.memory_space<semaphore_mem>>
      %43 = tpu.memref_squeeze %42 : memref<1x!tpu.dma_semaphore, #tpu.memory_space<semaphore_mem>> -> memref<!tpu.dma_semaphore, #tpu.memory_space<semaphore_mem>>
      tpu.enqueue_dma source(%40 : memref<1x128xf32, #tpu.memory_space<any>>) target(%41 : memref<1x128xf32, #tpu.memory_space<vmem>>) target_semaphore(%43 : memref<!tpu.dma_semaphore, #tpu.memory_space<semaphore_mem>>)
      %c1_i32 = arith.constant 1 : i32
      %c0_i32_24 = arith.constant 0 : i32
      %44 = tpu.memref_slice %arg2[%33, %c0_i32_24] : memref<16x128xf32, #tpu.memory_space<any>> -> memref<1x128xf32, #tpu.memory_space<any>>
      %c1_i32_25 = arith.constant 1 : i32
      %c0_i32_26 = arith.constant 0 : i32
      %45 = tpu.memref_slice %arg16[%c1_i32_25, %c0_i32_26] : memref<8x128xf32, #tpu.memory_space<vmem>> -> memref<1x128xf32, #tpu.memory_space<vmem>>
      %46 = tpu.memref_slice %arg20[%c1_i32] : memref<8x!tpu.dma_semaphore, #tpu.memory_space<semaphore_mem>> -> memref<1x!tpu.dma_semaphore, #tpu.memory_space<semaphore_mem>>
      %47 = tpu.memref_squeeze %46 : memref<1x!tpu.dma_semaphore, #tpu.memory_space<semaphore_mem>> -> memref<!tpu.dma_semaphore, #tpu.memory_space<semaphore_mem>>
      tpu.enqueue_dma source(%44 : memref<1x128xf32, #tpu.memory_space<any>>) target(%45 : memref<1x128xf32, #tpu.memory_space<vmem>>) target_semaphore(%47 : memref<!tpu.dma_semaphore, #tpu.memory_space<semaphore_mem>>)
      %c2_i32 = arith.constant 2 : i32
      %c0_i32_27 = arith.constant 0 : i32
      %48 = tpu.memref_slice %arg2[%34, %c0_i32_27] : memref<16x128xf32, #tpu.memory_space<any>> -> memref<1x128xf32, #tpu.memory_space<any>>
      %c2_i32_28 = arith.constant 2 : i32
      %c0_i32_29 = arith.constant 0 : i32
      %49 = tpu.memref_slice %arg16[%c2_i32_28, %c0_i32_29] : memref<8x128xf32, #tpu.memory_space<vmem>> -> memref<1x128xf32, #tpu.memory_space<vmem>>
      %50 = tpu.memref_slice %arg20[%c2_i32] : memref<8x!tpu.dma_semaphore, #tpu.memory_space<semaphore_mem>> -> memref<1x!tpu.dma_semaphore, #tpu.memory_space<semaphore_mem>>
      %51 = tpu.memref_squeeze %50 : memref<1x!tpu.dma_semaphore, #tpu.memory_space<semaphore_mem>> -> memref<!tpu.dma_semaphore, #tpu.memory_space<semaphore_mem>>
      tpu.enqueue_dma source(%48 : memref<1x128xf32, #tpu.memory_space<any>>) target(%49 : memref<1x128xf32, #tpu.memory_space<vmem>>) target_semaphore(%51 : memref<!tpu.dma_semaphore, #tpu.memory_space<semaphore_mem>>)
      %c3_i32 = arith.constant 3 : i32
      %c0_i32_30 = arith.constant 0 : i32
      %52 = tpu.memref_slice %arg2[%35, %c0_i32_30] : memref<16x128xf32, #tpu.memory_space<any>> -> memref<1x128xf32, #tpu.memory_space<any>>
      %c3_i32_31 = arith.constant 3 : i32
      %c0_i32_32 = arith.constant 0 : i32
      %53 = tpu.memref_slice %arg16[%c3_i32_31, %c0_i32_32] : memref<8x128xf32, #tpu.memory_space<vmem>> -> memref<1x128xf32, #tpu.memory_space<vmem>>
      %54 = tpu.memref_slice %arg20[%c3_i32] : memref<8x!tpu.dma_semaphore, #tpu.memory_space<semaphore_mem>> -> memref<1x!tpu.dma_semaphore, #tpu.memory_space<semaphore_mem>>
      %55 = tpu.memref_squeeze %54 : memref<1x!tpu.dma_semaphore, #tpu.memory_space<semaphore_mem>> -> memref<!tpu.dma_semaphore, #tpu.memory_space<semaphore_mem>>
      tpu.enqueue_dma source(%52 : memref<1x128xf32, #tpu.memory_space<any>>) target(%53 : memref<1x128xf32, #tpu.memory_space<vmem>>) target_semaphore(%55 : memref<!tpu.dma_semaphore, #tpu.memory_space<semaphore_mem>>)
      %c4_i32 = arith.constant 4 : i32
      %c0_i32_33 = arith.constant 0 : i32
      %56 = tpu.memref_slice %arg2[%36, %c0_i32_33] : memref<16x128xf32, #tpu.memory_space<any>> -> memref<1x128xf32, #tpu.memory_space<any>>
      %c4_i32_34 = arith.constant 4 : i32
      %c0_i32_35 = arith.constant 0 : i32
      %57 = tpu.memref_slice %arg16[%c4_i32_34, %c0_i32_35] : memref<8x128xf32, #tpu.memory_space<vmem>> -> memref<1x128xf32, #tpu.memory_space<vmem>>
      %58 = tpu.memref_slice %arg20[%c4_i32] : memref<8x!tpu.dma_semaphore, #tpu.memory_space<semaphore_mem>> -> memref<1x!tpu.dma_semaphore, #tpu.memory_space<semaphore_mem>>
      %59 = tpu.memref_squeeze %58 : memref<1x!tpu.dma_semaphore, #tpu.memory_space<semaphore_mem>> -> memref<!tpu.dma_semaphore, #tpu.memory_space<semaphore_mem>>
      tpu.enqueue_dma source(%56 : memref<1x128xf32, #tpu.memory_space<any>>) target(%57 : memref<1x128xf32, #tpu.memory_space<vmem>>) target_semaphore(%59 : memref<!tpu.dma_semaphore, #tpu.memory_space<semaphore_mem>>)
      %c5_i32 = arith.constant 5 : i32
      %c0_i32_36 = arith.constant 0 : i32
      %60 = tpu.memref_slice %arg2[%37, %c0_i32_36] : memref<16x128xf32, #tpu.memory_space<any>> -> memref<1x128xf32, #tpu.memory_space<any>>
      %c5_i32_37 = arith.constant 5 : i32
      %c0_i32_38 = arith.constant 0 : i32
      %61 = tpu.memref_slice %arg16[%c5_i32_37, %c0_i32_38] : memref<8x128xf32, #tpu.memory_space<vmem>> -> memref<1x128xf32, #tpu.memory_space<vmem>>
      %62 = tpu.memref_slice %arg20[%c5_i32] : memref<8x!tpu.dma_semaphore, #tpu.memory_space<semaphore_mem>> -> memref<1x!tpu.dma_semaphore, #tpu.memory_space<semaphore_mem>>
      %63 = tpu.memref_squeeze %62 : memref<1x!tpu.dma_semaphore, #tpu.memory_space<semaphore_mem>> -> memref<!tpu.dma_semaphore, #tpu.memory_space<semaphore_mem>>
      tpu.enqueue_dma source(%60 : memref<1x128xf32, #tpu.memory_space<any>>) target(%61 : memref<1x128xf32, #tpu.memory_space<vmem>>) target_semaphore(%63 : memref<!tpu.dma_semaphore, #tpu.memory_space<semaphore_mem>>)
      %c6_i32 = arith.constant 6 : i32
      %c0_i32_39 = arith.constant 0 : i32
      %64 = tpu.memref_slice %arg2[%38, %c0_i32_39] : memref<16x128xf32, #tpu.memory_space<any>> -> memref<1x128xf32, #tpu.memory_space<any>>
      %c6_i32_40 = arith.constant 6 : i32
      %c0_i32_41 = arith.constant 0 : i32
      %65 = tpu.memref_slice %arg16[%c6_i32_40, %c0_i32_41] : memref<8x128xf32, #tpu.memory_space<vmem>> -> memref<1x128xf32, #tpu.memory_space<vmem>>
      %66 = tpu.memref_slice %arg20[%c6_i32] : memref<8x!tpu.dma_semaphore, #tpu.memory_space<semaphore_mem>> -> memref<1x!tpu.dma_semaphore, #tpu.memory_space<semaphore_mem>>
      %67 = tpu.memref_squeeze %66 : memref<1x!tpu.dma_semaphore, #tpu.memory_space<semaphore_mem>> -> memref<!tpu.dma_semaphore, #tpu.memory_space<semaphore_mem>>
      tpu.enqueue_dma source(%64 : memref<1x128xf32, #tpu.memory_space<any>>) target(%65 : memref<1x128xf32, #tpu.memory_space<vmem>>) target_semaphore(%67 : memref<!tpu.dma_semaphore, #tpu.memory_space<semaphore_mem>>)
      %c7_i32 = arith.constant 7 : i32
      %c0_i32_42 = arith.constant 0 : i32
      %68 = tpu.memref_slice %arg2[%39, %c0_i32_42] : memref<16x128xf32, #tpu.memory_space<any>> -> memref<1x128xf32, #tpu.memory_space<any>>
      %c7_i32_43 = arith.constant 7 : i32
      %c0_i32_44 = arith.constant 0 : i32
      %69 = tpu.memref_slice %arg16[%c7_i32_43, %c0_i32_44] : memref<8x128xf32, #tpu.memory_space<vmem>> -> memref<1x128xf32, #tpu.memory_space<vmem>>
      %70 = tpu.memref_slice %arg20[%c7_i32] : memref<8x!tpu.dma_semaphore, #tpu.memory_space<semaphore_mem>> -> memref<1x!tpu.dma_semaphore, #tpu.memory_space<semaphore_mem>>
      %71 = tpu.memref_squeeze %70 : memref<1x!tpu.dma_semaphore, #tpu.memory_space<semaphore_mem>> -> memref<!tpu.dma_semaphore, #tpu.memory_space<semaphore_mem>>
      tpu.enqueue_dma source(%68 : memref<1x128xf32, #tpu.memory_space<any>>) target(%69 : memref<1x128xf32, #tpu.memory_space<vmem>>) target_semaphore(%71 : memref<!tpu.dma_semaphore, #tpu.memory_space<semaphore_mem>>)
      %c0_45 = arith.constant 0 : index
      %c0_46 = arith.constant 0 : index
      %72 = vector.load %arg4[%c0_45, %c0_46] : memref<8x128xf32, #tpu.memory_space<vmem>>, vector<8x128xf32>
      %73 = arith.truncf %72 : vector<8x128xf32> to vector<8x128xbf16>
      %c0_47 = arith.constant 0 : index
      %c0_48 = arith.constant 0 : index
      %74 = vector.load %arg10[%c0_47, %c0_48] : memref<128x384xbf16, #tpu.memory_space<vmem>>, vector<128x384xbf16>
      %cst_49 = arith.constant dense<0.000000e+00> : vector<8x384xf32>
      %75 = tpu.matmul %73, %74, %cst_49 {dimension_numbers = #tpu.dot_dimension_numbers<[1], [0], [0], [1], [0, 0, 1, 1], [], []>} : vector<8x128xbf16>, vector<128x384xbf16>, vector<8x384xf32> -> vector<8x384xf32>
      %c0_50 = arith.constant 0 : index
      %c0_51 = arith.constant 0 : index
      %76 = vector.load %arg11[%c0_50, %c0_51] : memref<1x384xf32, #tpu.memory_space<vmem>>, vector<1x384xf32>
      %77 = vector.broadcast %76 : vector<1x384xf32> to vector<8x384xf32>
      %78 = arith.addf %75, %77 : vector<8x384xf32>
      %c0_i32_52 = arith.constant 0 : i32
      %c0_i32_53 = arith.constant 0 : i32
      %79 = tpu.memref_slice %arg2[%32, %c0_i32_53] : memref<16x128xf32, #tpu.memory_space<any>> -> memref<1x128xf32, #tpu.memory_space<any>>
      %c0_i32_54 = arith.constant 0 : i32
      %c0_i32_55 = arith.constant 0 : i32
      %80 = tpu.memref_slice %arg16[%c0_i32_54, %c0_i32_55] : memref<8x128xf32, #tpu.memory_space<vmem>> -> memref<1x128xf32, #tpu.memory_space<vmem>>
      %81 = tpu.memref_slice %arg20[%c0_i32_52] : memref<8x!tpu.dma_semaphore, #tpu.memory_space<semaphore_mem>> -> memref<1x!tpu.dma_semaphore, #tpu.memory_space<semaphore_mem>>
      %82 = tpu.memref_squeeze %81 : memref<1x!tpu.dma_semaphore, #tpu.memory_space<semaphore_mem>> -> memref<!tpu.dma_semaphore, #tpu.memory_space<semaphore_mem>>
      tpu.wait_dma2 semaphore(%82 : memref<!tpu.dma_semaphore, #tpu.memory_space<semaphore_mem>>) src(%79 : memref<1x128xf32, #tpu.memory_space<any>>) dst(%80 : memref<1x128xf32, #tpu.memory_space<vmem>>)
      %c1_i32_56 = arith.constant 1 : i32
      %c0_i32_57 = arith.constant 0 : i32
      %83 = tpu.memref_slice %arg2[%33, %c0_i32_57] : memref<16x128xf32, #tpu.memory_space<any>> -> memref<1x128xf32, #tpu.memory_space<any>>
      %c1_i32_58 = arith.constant 1 : i32
      %c0_i32_59 = arith.constant 0 : i32
      %84 = tpu.memref_slice %arg16[%c1_i32_58, %c0_i32_59] : memref<8x128xf32, #tpu.memory_space<vmem>> -> memref<1x128xf32, #tpu.memory_space<vmem>>
      %85 = tpu.memref_slice %arg20[%c1_i32_56] : memref<8x!tpu.dma_semaphore, #tpu.memory_space<semaphore_mem>> -> memref<1x!tpu.dma_semaphore, #tpu.memory_space<semaphore_mem>>
      %86 = tpu.memref_squeeze %85 : memref<1x!tpu.dma_semaphore, #tpu.memory_space<semaphore_mem>> -> memref<!tpu.dma_semaphore, #tpu.memory_space<semaphore_mem>>
      tpu.wait_dma2 semaphore(%86 : memref<!tpu.dma_semaphore, #tpu.memory_space<semaphore_mem>>) src(%83 : memref<1x128xf32, #tpu.memory_space<any>>) dst(%84 : memref<1x128xf32, #tpu.memory_space<vmem>>)
      %c2_i32_60 = arith.constant 2 : i32
      %c0_i32_61 = arith.constant 0 : i32
      %87 = tpu.memref_slice %arg2[%34, %c0_i32_61] : memref<16x128xf32, #tpu.memory_space<any>> -> memref<1x128xf32, #tpu.memory_space<any>>
      %c2_i32_62 = arith.constant 2 : i32
      %c0_i32_63 = arith.constant 0 : i32
      %88 = tpu.memref_slice %arg16[%c2_i32_62, %c0_i32_63] : memref<8x128xf32, #tpu.memory_space<vmem>> -> memref<1x128xf32, #tpu.memory_space<vmem>>
      %89 = tpu.memref_slice %arg20[%c2_i32_60] : memref<8x!tpu.dma_semaphore, #tpu.memory_space<semaphore_mem>> -> memref<1x!tpu.dma_semaphore, #tpu.memory_space<semaphore_mem>>
      %90 = tpu.memref_squeeze %89 : memref<1x!tpu.dma_semaphore, #tpu.memory_space<semaphore_mem>> -> memref<!tpu.dma_semaphore, #tpu.memory_space<semaphore_mem>>
      tpu.wait_dma2 semaphore(%90 : memref<!tpu.dma_semaphore, #tpu.memory_space<semaphore_mem>>) src(%87 : memref<1x128xf32, #tpu.memory_space<any>>) dst(%88 : memref<1x128xf32, #tpu.memory_space<vmem>>)
      %c3_i32_64 = arith.constant 3 : i32
      %c0_i32_65 = arith.constant 0 : i32
      %91 = tpu.memref_slice %arg2[%35, %c0_i32_65] : memref<16x128xf32, #tpu.memory_space<any>> -> memref<1x128xf32, #tpu.memory_space<any>>
      %c3_i32_66 = arith.constant 3 : i32
      %c0_i32_67 = arith.constant 0 : i32
      %92 = tpu.memref_slice %arg16[%c3_i32_66, %c0_i32_67] : memref<8x128xf32, #tpu.memory_space<vmem>> -> memref<1x128xf32, #tpu.memory_space<vmem>>
      %93 = tpu.memref_slice %arg20[%c3_i32_64] : memref<8x!tpu.dma_semaphore, #tpu.memory_space<semaphore_mem>> -> memref<1x!tpu.dma_semaphore, #tpu.memory_space<semaphore_mem>>
      %94 = tpu.memref_squeeze %93 : memref<1x!tpu.dma_semaphore, #tpu.memory_space<semaphore_mem>> -> memref<!tpu.dma_semaphore, #tpu.memory_space<semaphore_mem>>
      tpu.wait_dma2 semaphore(%94 : memref<!tpu.dma_semaphore, #tpu.memory_space<semaphore_mem>>) src(%91 : memref<1x128xf32, #tpu.memory_space<any>>) dst(%92 : memref<1x128xf32, #tpu.memory_space<vmem>>)
      %c4_i32_68 = arith.constant 4 : i32
      %c0_i32_69 = arith.constant 0 : i32
      %95 = tpu.memref_slice %arg2[%36, %c0_i32_69] : memref<16x128xf32, #tpu.memory_space<any>> -> memref<1x128xf32, #tpu.memory_space<any>>
      %c4_i32_70 = arith.constant 4 : i32
      %c0_i32_71 = arith.constant 0 : i32
      %96 = tpu.memref_slice %arg16[%c4_i32_70, %c0_i32_71] : memref<8x128xf32, #tpu.memory_space<vmem>> -> memref<1x128xf32, #tpu.memory_space<vmem>>
      %97 = tpu.memref_slice %arg20[%c4_i32_68] : memref<8x!tpu.dma_semaphore, #tpu.memory_space<semaphore_mem>> -> memref<1x!tpu.dma_semaphore, #tpu.memory_space<semaphore_mem>>
      %98 = tpu.memref_squeeze %97 : memref<1x!tpu.dma_semaphore, #tpu.memory_space<semaphore_mem>> -> memref<!tpu.dma_semaphore, #tpu.memory_space<semaphore_mem>>
      tpu.wait_dma2 semaphore(%98 : memref<!tpu.dma_semaphore, #tpu.memory_space<semaphore_mem>>) src(%95 : memref<1x128xf32, #tpu.memory_space<any>>) dst(%96 : memref<1x128xf32, #tpu.memory_space<vmem>>)
      %c5_i32_72 = arith.constant 5 : i32
      %c0_i32_73 = arith.constant 0 : i32
      %99 = tpu.memref_slice %arg2[%37, %c0_i32_73] : memref<16x128xf32, #tpu.memory_space<any>> -> memref<1x128xf32, #tpu.memory_space<any>>
      %c5_i32_74 = arith.constant 5 : i32
      %c0_i32_75 = arith.constant 0 : i32
      %100 = tpu.memref_slice %arg16[%c5_i32_74, %c0_i32_75] : memref<8x128xf32, #tpu.memory_space<vmem>> -> memref<1x128xf32, #tpu.memory_space<vmem>>
      %101 = tpu.memref_slice %arg20[%c5_i32_72] : memref<8x!tpu.dma_semaphore, #tpu.memory_space<semaphore_mem>> -> memref<1x!tpu.dma_semaphore, #tpu.memory_space<semaphore_mem>>
      %102 = tpu.memref_squeeze %101 : memref<1x!tpu.dma_semaphore, #tpu.memory_space<semaphore_mem>> -> memref<!tpu.dma_semaphore, #tpu.memory_space<semaphore_mem>>
      tpu.wait_dma2 semaphore(%102 : memref<!tpu.dma_semaphore, #tpu.memory_space<semaphore_mem>>) src(%99 : memref<1x128xf32, #tpu.memory_space<any>>) dst(%100 : memref<1x128xf32, #tpu.memory_space<vmem>>)
      %c6_i32_76 = arith.constant 6 : i32
      %c0_i32_77 = arith.constant 0 : i32
      %103 = tpu.memref_slice %arg2[%38, %c0_i32_77] : memref<16x128xf32, #tpu.memory_space<any>> -> memref<1x128xf32, #tpu.memory_space<any>>
      %c6_i32_78 = arith.constant 6 : i32
      %c0_i32_79 = arith.constant 0 : i32
      %104 = tpu.memref_slice %arg16[%c6_i32_78, %c0_i32_79] : memref<8x128xf32, #tpu.memory_space<vmem>> -> memref<1x128xf32, #tpu.memory_space<vmem>>
      %105 = tpu.memref_slice %arg20[%c6_i32_76] : memref<8x!tpu.dma_semaphore, #tpu.memory_space<semaphore_mem>> -> memref<1x!tpu.dma_semaphore, #tpu.memory_space<semaphore_mem>>
      %106 = tpu.memref_squeeze %105 : memref<1x!tpu.dma_semaphore, #tpu.memory_space<semaphore_mem>> -> memref<!tpu.dma_semaphore, #tpu.memory_space<semaphore_mem>>
      tpu.wait_dma2 semaphore(%106 : memref<!tpu.dma_semaphore, #tpu.memory_space<semaphore_mem>>) src(%103 : memref<1x128xf32, #tpu.memory_space<any>>) dst(%104 : memref<1x128xf32, #tpu.memory_space<vmem>>)
      %c7_i32_80 = arith.constant 7 : i32
      %c0_i32_81 = arith.constant 0 : i32
      %107 = tpu.memref_slice %arg2[%39, %c0_i32_81] : memref<16x128xf32, #tpu.memory_space<any>> -> memref<1x128xf32, #tpu.memory_space<any>>
      %c7_i32_82 = arith.constant 7 : i32
      %c0_i32_83 = arith.constant 0 : i32
      %108 = tpu.memref_slice %arg16[%c7_i32_82, %c0_i32_83] : memref<8x128xf32, #tpu.memory_space<vmem>> -> memref<1x128xf32, #tpu.memory_space<vmem>>
      %109 = tpu.memref_slice %arg20[%c7_i32_80] : memref<8x!tpu.dma_semaphore, #tpu.memory_space<semaphore_mem>> -> memref<1x!tpu.dma_semaphore, #tpu.memory_space<semaphore_mem>>
      %110 = tpu.memref_squeeze %109 : memref<1x!tpu.dma_semaphore, #tpu.memory_space<semaphore_mem>> -> memref<!tpu.dma_semaphore, #tpu.memory_space<semaphore_mem>>
      tpu.wait_dma2 semaphore(%110 : memref<!tpu.dma_semaphore, #tpu.memory_space<semaphore_mem>>) src(%107 : memref<1x128xf32, #tpu.memory_space<any>>) dst(%108 : memref<1x128xf32, #tpu.memory_space<vmem>>)
      %c0_84 = arith.constant 0 : index
      %c0_85 = arith.constant 0 : index
      %111 = vector.load %arg16[%c0_84, %c0_85] : memref<8x128xf32, #tpu.memory_space<vmem>>, vector<8x128xf32>
      %112 = arith.truncf %111 : vector<8x128xf32> to vector<8x128xbf16>
      %c0_86 = arith.constant 0 : index
      %c0_87 = arith.constant 0 : index
      %113 = vector.load %arg5[%c0_86, %c0_87] : memref<128x128xbf16, #tpu.memory_space<vmem>>, vector<128x128xbf16>
      %cst_88 = arith.constant dense<0.000000e+00> : vector<8x128xf32>
      %114 = tpu.matmul %112, %113, %cst_88 {dimension_numbers = #tpu.dot_dimension_numbers<[1], [0], [0], [1], [0, 0, 1, 1], [], []>} : vector<8x128xbf16>, vector<128x128xbf16>, vector<8x128xf32> -> vector<8x128xf32>
      %c0_89 = arith.constant 0 : index
      %c0_90 = arith.constant 0 : index
      %115 = vector.load %arg3[%c0_89, %c0_90] : memref<8x128xf32, #tpu.memory_space<vmem>>, vector<8x128xf32>
      %116 = arith.truncf %115 : vector<8x128xf32> to vector<8x128xbf16>
      %c0_91 = arith.constant 0 : index
      %c0_92 = arith.constant 0 : index
      %117 = vector.load %arg6[%c0_91, %c0_92] : memref<128x128xbf16, #tpu.memory_space<vmem>>, vector<128x128xbf16>
      %cst_93 = arith.constant dense<0.000000e+00> : vector<8x128xf32>
      %118 = tpu.matmul %116, %117, %cst_93 {dimension_numbers = #tpu.dot_dimension_numbers<[1], [0], [0], [1], [0, 0, 1, 1], [], []>} : vector<8x128xbf16>, vector<128x128xbf16>, vector<8x128xf32> -> vector<8x128xf32>
      %119 = arith.addf %114, %118 : vector<8x128xf32>
      %c0_94 = arith.constant 0 : index
      %c0_95 = arith.constant 0 : index
      %120 = vector.load %arg7[%c0_94, %c0_95] : memref<1x128xf32, #tpu.memory_space<vmem>>, vector<1x128xf32>
      %121 = vector.broadcast %120 : vector<1x128xf32> to vector<8x128xf32>
      %122 = arith.addf %119, %121 : vector<8x128xf32>
      %123 = arith.truncf %122 : vector<8x128xf32> to vector<8x128xbf16>
      %c0_96 = arith.constant 0 : index
      %c0_97 = arith.constant 0 : index
      %124 = vector.load %arg8[%c0_96, %c0_97] : memref<128x384xbf16, #tpu.memory_space<vmem>>, vector<128x384xbf16>
      %cst_98 = arith.constant dense<0.000000e+00> : vector<8x384xf32>
      %125 = tpu.matmul %123, %124, %cst_98 {dimension_numbers = #tpu.dot_dimension_numbers<[1], [0], [0], [1], [0, 0, 1, 1], [], []>} : vector<8x128xbf16>, vector<128x384xbf16>, vector<8x384xf32> -> vector<8x384xf32>
      %c0_99 = arith.constant 0 : index
      %c0_100 = arith.constant 0 : index
      %126 = vector.load %arg9[%c0_99, %c0_100] : memref<1x384xf32, #tpu.memory_space<vmem>>, vector<1x384xf32>
      %127 = vector.broadcast %126 : vector<1x384xf32> to vector<8x384xf32>
      %128 = arith.addf %125, %127 : vector<8x384xf32>
      %129 = vector.extract_strided_slice %128 {offsets = [0, 0], sizes = [8, 128], strides = [1, 1]} : vector<8x384xf32> to vector<8x128xf32>
      %130 = vector.extract_strided_slice %78 {offsets = [0, 0], sizes = [8, 128], strides = [1, 1]} : vector<8x384xf32> to vector<8x128xf32>
      %131 = arith.addf %129, %130 : vector<8x128xf32>
      %132 = arith.negf %131 : vector<8x128xf32>
      %133 = math.exp %132 : vector<8x128xf32>
      %cst_101 = arith.constant 1.000000e+00 : f32
      %134 = vector.broadcast %cst_101 : f32 to vector<8x128xf32>
      %135 = arith.addf %134, %133 : vector<8x128xf32>
      %136 = arith.divf %134, %135 : vector<8x128xf32>
      %137 = vector.extract_strided_slice %128 {offsets = [0, 128], sizes = [8, 128], strides = [1, 1]} : vector<8x384xf32> to vector<8x128xf32>
      %138 = vector.extract_strided_slice %78 {offsets = [0, 128], sizes = [8, 128], strides = [1, 1]} : vector<8x384xf32> to vector<8x128xf32>
      %139 = arith.addf %137, %138 : vector<8x128xf32>
      %140 = arith.negf %139 : vector<8x128xf32>
      %141 = math.exp %140 : vector<8x128xf32>
      %cst_102 = arith.constant 1.000000e+00 : f32
      %142 = vector.broadcast %cst_102 : f32 to vector<8x128xf32>
      %143 = arith.addf %142, %141 : vector<8x128xf32>
      %144 = arith.divf %142, %143 : vector<8x128xf32>
      %145 = vector.extract_strided_slice %128 {offsets = [0, 256], sizes = [8, 128], strides = [1, 1]} : vector<8x384xf32> to vector<8x128xf32>
      %146 = vector.extract_strided_slice %78 {offsets = [0, 256], sizes = [8, 128], strides = [1, 1]} : vector<8x384xf32> to vector<8x128xf32>
      %147 = arith.mulf %136, %146 : vector<8x128xf32>
      %148 = arith.addf %145, %147 : vector<8x128xf32>
      %149 = math.tanh %148 : vector<8x128xf32>
      %cst_103 = arith.constant 1.000000e+00 : f32
      %150 = vector.broadcast %cst_103 : f32 to vector<8x128xf32>
      %151 = arith.subf %150, %144 : vector<8x128xf32>
      %152 = arith.mulf %151, %149 : vector<8x128xf32>
      %153 = arith.mulf %144, %72 : vector<8x128xf32>
      %154 = arith.addf %152, %153 : vector<8x128xf32>
      %c0_104 = arith.constant 0 : index
      %c0_105 = arith.constant 0 : index
      %155 = vector.load %arg15[%c0_104, %c0_105] : memref<8x128xf32, #tpu.memory_space<vmem>>, vector<8x128xf32>
      tpu.vector_store %arg15[%c0_104, %c0_105], %154 {strides = array<i32>} : memref<8x128xf32, #tpu.memory_space<vmem>>, vector<8x128xf32>,
      %156 = arith.truncf %154 : vector<8x128xf32> to vector<8x128xbf16>
      %c0_106 = arith.constant 0 : index
      %c0_107 = arith.constant 0 : index
      %157 = vector.load %arg17[%c0_106, %c0_107] : memref<8x128xbf16, #tpu.memory_space<vmem>>, vector<8x128xbf16>
      tpu.vector_store %arg17[%c0_106, %c0_107], %156 {strides = array<i32>} : memref<8x128xbf16, #tpu.memory_space<vmem>>, vector<8x128xbf16>,
      %cst_108 = arith.constant 0xFF800000 : f32
      %158 = vector.broadcast %cst_108 : f32 to vector<8x1xf32>
      %c0_109 = arith.constant 0 : index
      %c0_110 = arith.constant 0 : index
      %159 = vector.load %arg18[%c0_109, %c0_110] : memref<8x1xf32, #tpu.memory_space<vmem>>, vector<8x1xf32>
      tpu.vector_store %arg18[%c0_109, %c0_110], %158 {strides = array<i32>} : memref<8x1xf32, #tpu.memory_space<vmem>>, vector<8x1xf32>,
      %cst_111 = arith.constant 0.000000e+00 : f32
      %160 = vector.broadcast %cst_111 : f32 to vector<8x1xf32>
      %c0_112 = arith.constant 0 : index
      %c0_113 = arith.constant 0 : index
      %161 = vector.load %arg19[%c0_112, %c0_113] : memref<8x1xf32, #tpu.memory_space<vmem>>, vector<8x1xf32>
      tpu.vector_store %arg19[%c0_112, %c0_113], %160 {strides = array<i32>} : memref<8x1xf32, #tpu.memory_space<vmem>>, vector<8x1xf32>,
    } else {
    }
    %c0 = arith.constant 0 : index
    %c0_1 = arith.constant 0 : index
    %3 = vector.load %arg17[%c0, %c0_1] : memref<8x128xbf16, #tpu.memory_space<vmem>>, vector<8x128xbf16>
    %c0_2 = arith.constant 0 : index
    %c0_3 = arith.constant 0 : index
    %4 = vector.load %arg12[%c0_2, %c0_3] : memref<128x128xbf16, #tpu.memory_space<vmem>>, vector<128x128xbf16>
    %cst = arith.constant dense<0.000000e+00> : vector<8x128xf32>
    %5 = tpu.matmul %3, %4, %cst {dimension_numbers = #tpu.dot_dimension_numbers<[1], [0], [0], [1], [0, 0, 1, 1], [], []>} : vector<8x128xbf16>, vector<128x128xbf16>, vector<8x128xf32> -> vector<8x128xf32>
    %c0_4 = arith.constant 0 : index
    %c0_5 = arith.constant 0 : index
    %6 = vector.load %arg13[%c0_4, %c0_5] : memref<1x128xf32, #tpu.memory_space<vmem>>, vector<1x128xf32>
    %7 = vector.broadcast %6 : vector<1x128xf32> to vector<8x128xf32>
    %8 = arith.addf %5, %7 : vector<8x128xf32>
    %c128_i32 = arith.constant 128 : i32
    %9 = arith.muli %arg0, %c128_i32 : i32
    %10 = tpu.assume_multiple %9, 128 : i32
    %c0_6 = arith.constant 0 : index
    %11 = arith.index_cast %10 : i32 to index
    %12 = vector.load %arg14[%c0_6, %11] : memref<8x128xf32, #tpu.memory_space<vmem>>, vector<8x128xf32>
    tpu.vector_store %arg14[%c0_6, %11], %8 {strides = array<i32>} : memref<8x128xf32, #tpu.memory_space<vmem>>, vector<8x128xf32>,
    %c0_7 = arith.constant 0 : index
    %c0_8 = arith.constant 0 : index
    %13 = vector.load %arg18[%c0_7, %c0_8] : memref<8x1xf32, #tpu.memory_space<vmem>>, vector<8x1xf32>
    %cst_9 = arith.constant dense<0xFF800000> : vector<8xf32>
    %14 = vector.multi_reduction <maximumf>, %8, %cst_9 [1] : vector<8x128xf32> to vector<8xf32>
    %15 = vector.shape_cast %14 : vector<8xf32> to vector<8x1xf32>
    %16 = arith.maximumf %13, %15 : vector<8x1xf32>
    %c0_10 = arith.constant 0 : index
    %c0_11 = arith.constant 0 : index
    %17 = vector.load %arg19[%c0_10, %c0_11] : memref<8x1xf32, #tpu.memory_space<vmem>>, vector<8x1xf32>
    %18 = arith.subf %13, %16 : vector<8x1xf32>
    %19 = math.exp %18 : vector<8x1xf32>
    %20 = arith.mulf %17, %19 : vector<8x1xf32>
    %21 = vector.broadcast %16 : vector<8x1xf32> to vector<8x128xf32>
    %22 = arith.subf %8, %21 : vector<8x128xf32>
    %23 = math.exp %22 : vector<8x128xf32>
    %cst_12 = arith.constant dense<0.000000e+00> : vector<8xf32>
    %24 = vector.multi_reduction <add>, %23, %cst_12 [1] : vector<8x128xf32> to vector<8xf32>
    %25 = vector.shape_cast %24 : vector<8xf32> to vector<8x1xf32>
    %26 = arith.addf %20, %25 : vector<8x1xf32>
    %c0_13 = arith.constant 0 : index
    %c0_14 = arith.constant 0 : index
    %27 = vector.load %arg19[%c0_13, %c0_14] : memref<8x1xf32, #tpu.memory_space<vmem>>, vector<8x1xf32>
    tpu.vector_store %arg19[%c0_13, %c0_14], %26 {strides = array<i32>} : memref<8x1xf32, #tpu.memory_space<vmem>>, vector<8x1xf32>,
    %c0_15 = arith.constant 0 : index
    %c0_16 = arith.constant 0 : index
    %28 = vector.load %arg18[%c0_15, %c0_16] : memref<8x1xf32, #tpu.memory_space<vmem>>, vector<8x1xf32>
    tpu.vector_store %arg18[%c0_15, %c0_16], %16 {strides = array<i32>} : memref<8x1xf32, #tpu.memory_space<vmem>>, vector<8x1xf32>,
    %c0_i32_17 = arith.constant 0 : i32
    %29 = arith.cmpi eq, %arg0, %c0_i32_17 : i32
    %30 = arith.extui %29 : i1 to i32
    %c0_i32_18 = arith.constant 0 : i32
    %31 = arith.cmpi ne, %30, %c0_i32_18 : i32
    scf.if %31 {
      %c0_19 = arith.constant 0 : index
      %c0_20 = arith.constant 0 : index
      %32 = vector.load %arg18[%c0_19, %c0_20] : memref<8x1xf32, #tpu.memory_space<vmem>>, vector<8x1xf32>
      %c0_21 = arith.constant 0 : index
      %c0_22 = arith.constant 0 : index
      %33 = vector.load %arg19[%c0_21, %c0_22] : memref<8x1xf32, #tpu.memory_space<vmem>>, vector<8x1xf32>
      %34 = math.log %33 : vector<8x1xf32>
      %35 = arith.addf %32, %34 : vector<8x1xf32>
      %c0_23 = arith.constant 0 : index
      %c0_24 = arith.constant 0 : index
      %36 = vector.load %arg14[%c0_23, %c0_24] : memref<8x128xf32, #tpu.memory_space<vmem>>, vector<8x128xf32>
      %37 = vector.broadcast %35 : vector<8x1xf32> to vector<8x128xf32>
      %38 = arith.subf %36, %37 : vector<8x128xf32>
      %c0_25 = arith.constant 0 : index
      %c0_26 = arith.constant 0 : index
      %39 = vector.load %arg14[%c0_25, %c0_26] : memref<8x128xf32, #tpu.memory_space<vmem>>, vector<8x128xf32>
      tpu.vector_store %arg14[%c0_25, %c0_26], %38 {strides = array<i32>} : memref<8x128xf32, #tpu.memory_space<vmem>>, vector<8x128xf32>,
    } else {
    }
    return
  }
  func.func @transform_1(%arg0: i32, %arg1: memref<8xi32, #tpu.memory_space<smem>>) -> (i32, i32) {
    %c0_i32 = arith.constant 0 : i32
    %c0_i32_0 = arith.constant 0 : i32
    %c0_i32_1 = arith.constant 0 : i32
    return %c0_i32, %c0_i32_0 : i32, i32
  }
  func.func @transform_2(%arg0: i32, %arg1: memref<8xi32, #tpu.memory_space<smem>>) -> (i32, i32) {
    %c0_i32 = arith.constant 0 : i32
    %c0_i32_0 = arith.constant 0 : i32
    %c0_i32_1 = arith.constant 0 : i32
    return %c0_i32, %c0_i32_0 : i32, i32
  }
  func.func @transform_3(%arg0: i32, %arg1: memref<8xi32, #tpu.memory_space<smem>>) -> (i32, i32) {
    %c0_i32 = arith.constant 0 : i32
    %c0_i32_0 = arith.constant 0 : i32
    %c0_i32_1 = arith.constant 0 : i32
    return %c0_i32, %c0_i32_0 : i32, i32
  }
  func.func @transform_4(%arg0: i32, %arg1: memref<8xi32, #tpu.memory_space<smem>>) -> (i32, i32) {
    %c0_i32 = arith.constant 0 : i32
    %c0_i32_0 = arith.constant 0 : i32
    %c0_i32_1 = arith.constant 0 : i32
    return %c0_i32, %c0_i32_0 : i32, i32
  }
  func.func @transform_5(%arg0: i32, %arg1: memref<8xi32, #tpu.memory_space<smem>>) -> (i32, i32) {
    %c0_i32 = arith.constant 0 : i32
    %c0_i32_0 = arith.constant 0 : i32
    %c0_i32_1 = arith.constant 0 : i32
    return %c0_i32, %c0_i32_0 : i32, i32
  }
  func.func @transform_6(%arg0: i32, %arg1: memref<8xi32, #tpu.memory_space<smem>>) -> (i32, i32) {
    %c0_i32 = arith.constant 0 : i32
    %c0_i32_0 = arith.constant 0 : i32
    %c0_i32_1 = arith.constant 0 : i32
    return %c0_i32, %c0_i32_0 : i32, i32
  }
  func.func @transform_7(%arg0: i32, %arg1: memref<8xi32, #tpu.memory_space<smem>>) -> (i32, i32) {
    %c0_i32 = arith.constant 0 : i32
    %c0_i32_0 = arith.constant 0 : i32
    %c0_i32_1 = arith.constant 0 : i32
    return %c0_i32, %c0_i32_0 : i32, i32
  }
  func.func @transform_8(%arg0: i32, %arg1: memref<8xi32, #tpu.memory_space<smem>>) -> (i32, i32) {
    %c0_i32 = arith.constant 0 : i32
    %c0_i32_0 = arith.constant 0 : i32
    %c0_i32_1 = arith.constant 0 : i32
    return %c0_i32, %c0_i32_0 : i32, i32
  }
  func.func @transform_9(%arg0: i32, %arg1: memref<8xi32, #tpu.memory_space<smem>>) -> (i32, i32) {
    %c0_i32 = arith.constant 0 : i32
    %c0_i32_0 = arith.constant 0 : i32
    %c0_i32_1 = arith.constant 0 : i32
    return %c0_i32, %c0_i32_0 : i32, i32
  }
  func.func @transform_10(%arg0: i32, %arg1: memref<8xi32, #tpu.memory_space<smem>>) -> (i32, i32) {
    %c0_i32 = arith.constant 0 : i32
    %c0_i32_0 = arith.constant 0 : i32
    return %c0_i32, %arg0 : i32, i32
  }
  func.func @transform_11(%arg0: i32, %arg1: memref<8xi32, #tpu.memory_space<smem>>) -> (i32, i32) {
    %c0_i32 = arith.constant 0 : i32
    %c0_i32_0 = arith.constant 0 : i32
    return %c0_i32, %arg0 : i32, i32
  }
  func.func @transform_12(%arg0: i32, %arg1: memref<8xi32, #tpu.memory_space<smem>>) -> (i32, i32) {
    %c0_i32 = arith.constant 0 : i32
    %c0_i32_0 = arith.constant 0 : i32
    %c0_i32_1 = arith.constant 0 : i32
    return %c0_i32, %c0_i32_0 : i32, i32
  }
  func.func @transform_13(%arg0: i32, %arg1: memref<8xi32, #tpu.memory_space<smem>>) -> (i32, i32) {
    %c0_i32 = arith.constant 0 : i32
    %c0_i32_0 = arith.constant 0 : i32
    %c0_i32_1 = arith.constant 0 : i32
    return %c0_i32, %c0_i32_0 : i32, i32
  }
}

</mosaic_0001>

<bundles_post_ra>
// kernel: decoder_forward.1
= control target key start
LH: loop header
LB: loop body
LE: loop exit
PB: predicated region body
PF: predicated region fallthrough
CT: control target
= control target key end

     0   :  { %s2358_s0 = inlined_call_operand.vmem [shape: s32[8], index: 0, kind: input, shape index: {}]   ;;  %s2359_s1 = inlined_call_operand.vmem [shape: f32[16,128], index: 1, kind: input, shape index: {}]   ;;  %s2360_s2 = inlined_call_operand.vmem [shape: f32[8,128], index: 2, kind: input, shape index: {}]   ;;  %s2361_s3 = inlined_call_operand.vmem [shape: f32[8,128], index: 3, kind: input, shape index: {}, may-alias: {3,14}]   ;;  %s2362_s4 = inlined_call_operand.vmem [shape: bf16[128,128], index: 4, kind: input, shape index: {}]   ;;  %s2363_s5 = inlined_call_operand.vmem [shape: bf16[128,128], index: 5, kind: input, shape index: {}]   ;;  %s2364_s6 = inlined_call_operand.vmem [shape: f32[1,128], index: 6, kind: input, shape index: {}]   ;;  %s2365_s7 = inlined_call_operand.vmem [shape: bf16[128,384], index: 7, kind: input, shape index: {}]   ;;  %s2366_s8 = inlined_call_operand.vmem [shape: f32[1,384], index: 8, kind: input, shape index: {}]   ;;  %s2367_s9 = inlined_call_operand.vmem [shape: bf16[128,384], index: 9, kind: input, shape index: {}]   ;;  %s2368_s10 = inlined_call_operand.vmem [shape: f32[1,384], index: 10, kind: input, shape index: {}]   ;;  %s2369_s11 = inlined_call_operand.vmem [shape: bf16[128,128], index: 11, kind: input, shape index: {}]   ;;  %s2370_s12 = inlined_call_operand.vmem [shape: f32[1,128], index: 12, kind: input, shape index: {}]   ;;  %s2371_s13 = inlined_call_operand.vmem [shape: f32[8,128], index: 13, kind: output, shape index: {0}]   ;;  %s2372_s14 = inlined_call_operand.vmem [shape: f32[8,128], index: 14, kind: output, shape index: {1}, may-alias: {3,14}]  }
   0x1   :  { %2373 = sst [smem:[#allocation26_spill]] %s2371_s13  ;;  %s20_s15 = sshll.u32 %s2358_s0, 4  ;;  %s21_s15 = int_to_ptr.vmem [resolvable:$true] %s20_s15 }
   0x2   :  { %s1888_s16 = scalar_lea.vmem %s21_s15, 16  ;;  %p1893_p1 = scmp.lt.s32.totalorder %s21_s15, %s21_s15 }
   0x3   :  { %p1889_p0 = scmp.ne.s32.totalorder %s21_s15, %s1888_s16  ;;  %p1894_p2 = scmp.lt.s32.totalorder %s1888_s16, %s1888_s16 }
   0x5   :  { %p1895_p3 = por %p1894_p2, %p1893_p1 }
   0x7   :  { %p1896_p4 = pnand %p1895_p3, %p1889_p0 }
   0x9   :  { %1899 = shalt.err (!%p1896_p4)  }
   0xa   :  { %s1918_s17 = smov [#allocation8]  }
   0xb   :  { %23 = dma.vmem_to_smem %s21_s15, 16, %s1918_s17, [#allocation7] }
   0xc   :  { %1900 = dma.done.wait [#allocation7], 16 }
   0xd   :  { %1901 = vsyncadd [#allocation7], 4294967280 }
   0xe   :  { %25 = sfence }
   0xf   :  { %s53_s18 = sld [smem:[#allocation8]]  ;;  %s1533_s19 = sld [smem:[#allocation8 + $0x1]] }
  0x10   :  { %s1534_s20 = sld [smem:[#allocation8 + $0x2]]  ;;  %s1535_s21 = sld [smem:[#allocation8 + $0x3]] }
  0x11   :  { %s1536_s22 = sld [smem:[#allocation8 + $0x4]]  ;;  %s1537_s23 = sld [smem:[#allocation8 + $0x5]] }
  0x12   :  { %s1538_s0 = sld [smem:[#allocation8 + $0x6]]  ;;  %s2001_s24 = sld [smem:[#allocation8 + $0x7]] }
  0x15   :  { %s61_s27 = scalar_lea.vmem %s2359_s1, %s53_s18 }
  0x16   :  { %v79_v0 = vld [vmem:[%s61_s27] sm:$0x1] }
  0x17   :  { %80 = vst [vmem:[#allocation2] sm:$0x1] %v79_v0 }
  0x18   :  { %105 = vsyncadd [#allocation6], 16  ;;  %s106_s30 = scalar_lea.vmem %s2359_s1, %s1533_s19 }
  0x19   :  { %v126_v1 = vld [vmem:[%s106_s30] sm:$0x1] }
  0x1a   :  { %127 = vst [vmem:[#allocation2 + $0x1] sm:$0x1] %v126_v1 }
  0x1b   :  { %152 = vsyncadd [#allocation6 + $0x1], 16  ;;  %s153_s17 = scalar_lea.vmem %s2359_s1, %s1534_s20 }
  0x1c   :  { %v173_v2 = vld [vmem:[%s153_s17] sm:$0x1] }
  0x1d   :  { %174 = vst [vmem:[#allocation2 + $0x2] sm:$0x1] %v173_v2 }
  0x1e   :  { %199 = vsyncadd [#allocation6 + $0x2], 16  ;;  %s200_s18 = scalar_lea.vmem %s2359_s1, %s1535_s21 }
  0x1f   :  { %v220_v3 = vld [vmem:[%s200_s18] sm:$0x1] }
  0x20   :  { %221 = vst [vmem:[#allocation2 + $0x3] sm:$0x1] %v220_v3 }
  0x21   :  { %246 = vsyncadd [#allocation6 + $0x3], 16  ;;  %s247_s19 = scalar_lea.vmem %s2359_s1, %s1536_s22 }
  0x22   :  { %v267_v4 = vld [vmem:[%s247_s19] sm:$0x1] }
  0x23   :  { %268 = vst [vmem:[#allocation2 + $0x4] sm:$0x1] %v267_v4 }
  0x24   :  { %293 = vsyncadd [#allocation6 + $0x4], 16  ;;  %s294_s20 = scalar_lea.vmem %s2359_s1, %s1537_s23 }
  0x25   :  { %v314_v5 = vld [vmem:[%s294_s20] sm:$0x1] }
  0x26   :  { %315 = vst [vmem:[#allocation2 + $0x5] sm:$0x1] %v314_v5 }
  0x27   :  { %340 = vsyncadd [#allocation6 + $0x5], 16  ;;  %s341_s21 = scalar_lea.vmem %s2359_s1, %s1538_s0 }
  0x28   :  { %v361_v6 = vld [vmem:[%s341_s21] sm:$0x1] }
  0x29   :  { %362 = vst [vmem:[#allocation2 + $0x6] sm:$0x1] %v361_v6 }
  0x2a   :  { %387 = vsyncadd [#allocation6 + $0x6], 16  ;;  %s388_s16 = scalar_lea.vmem %s2359_s1, %s2001_s24  ;;  %v1919_v8 = vmov 0.0   ;;  %v1782_v9 = vld [vmem:[%s2367_s9 + $0x8] ss:$12 sps:$4 sm:$0xff]   ;;  %vm1920_vm0 = vmmov 0  }
  0x2b   :  { %v408_v7 = vld [vmem:[%s388_s16] sm:$0x1]  ;;  %1669 = vmatprep.subr.bf16.mxu1 %v1919_v8  ;;  %1685 = vmatprep.mubr.msk.bf16.mxu1 %vm1920_vm0, %v1919_v8  ;;  %v1784_v11 = vld [vmem:[%s2367_s9 + $0x38] ss:$12 sps:$4 sm:$0xff]  }
  0x2c   :  { %409 = vst [vmem:[#allocation2 + $0x7] sm:$0x1] %v408_v7  ;;  %1670 = vmatpush3.bf16.msra.mxu1 %v1782_v9  ;;  %v1783_v10 = vld [vmem:[%s2367_s9 + $0x20] ss:$12 sps:$4 sm:$0xff]  }
  0x2d   :  { %1671 = vmatprep.subr.bf16.mxu1 %v1919_v8 }
  0x30   :  { %1672 = vmatpush3.bf16.msra.mxu1 %v1783_v10 }
  0x31   :  { %1673 = vmatprep.subr.bf16.mxu1 %v1919_v8 }
  0x32   :  { %434 = vsyncadd [#allocation6 + $0x7], 16  ;;  %v1790_v12 = vld [vmem:[%s2367_s9 + $0x4] ss:$12 sps:$4 sm:$0xff]   ;;  %v1792_v13 = vld [vmem:[%s2367_s9] ss:$12 sps:$4 sm:$0xff]   ;;  %v471_v14 = vlaneseq }
  0x33   :  { %v1785_v15 = vld [vmem:[%s2367_s9 + $0x50] ss:$12 sps:$4 sm:$0xff]   ;;  %614 = vmatprep.subr.bf16.mxu0 %v1790_v12  ;;  %v1795_v17 = vld [vmem:[%s2367_s9 + $0x18] ss:$12 sps:$4 sm:$0xff]   ;;  %v1796_v18 = vld [vmem:[%s2367_s9 + $0x34] ss:$12 sps:$4 sm:$0xff]  }
  0x34   :  { %1674 = vmatpush3.bf16.msra.mxu1 %v1784_v11  ;;  %v1793_v16 = vld [vmem:[%s2367_s9 + $0x1c] ss:$12 sps:$4 sm:$0xff]   ;;  %615 = vmatpush1.bf16.msra.mxu0 %v1792_v13  ;;  %v2061_v19 = vshrl.u32 %v471_v14, 7  ;;  %v1799_v24 = vld [vmem:[%s2367_s9 + $0x4c] ss:$12 sps:$4 sm:$0xff]   ;;  %v2112_v35 = vld [vmem:[%s2361_s3] sm:$0xff] }
  0x35   :  { %1675 = vmatprep.subr.bf16.mxu1 %v1919_v8  ;;  %616 = vmatprep.subr.bf16.mxu0 %v1793_v16  ;;  %v1786_v20 = vld [vmem:[%s2367_s9 + $0x68] ss:$12 sps:$4 sm:$0xff]   ;;  %v1798_v21 = vld [vmem:[%s2367_s9 + $0x30] ss:$12 sps:$4 sm:$0xff]   ;;  %v1787_v25 = vld [vmem:[%s2367_s9 + $0x80] ss:$12 sps:$4 sm:$0xff]   ;;  %v436_v38 = vpack.c.bf16 %v2112_v35, %v2112_v35 }
  0x36   :  { %v473_v22 = vsub.s32 0, %v2061_v19  ;;  %v477_v23 = vsub.s32 1, %v2061_v19  ;;  %v469_v26 = vld [vmem:[%s2368_s10] sm:$0x7]  ;;  %v1801_v27 = vld [vmem:[%s2367_s9 + $0x48] ss:$12 sps:$4 sm:$0xff]  }
  0x37   :  { %v1802_v30 = vld [vmem:[%s2367_s9 + $0x64] ss:$12 sps:$4 sm:$0xff]   ;;  %v1804_v32 = vld [vmem:[%s2367_s9 + $0x60] ss:$12 sps:$4 sm:$0xff]   ;;  %v1805_v33 = vld [vmem:[%s2367_s9 + $0x7c] ss:$12 sps:$4 sm:$0xff]  }
  0x38   :  { %1676 = vmatpush3.bf16.msra.mxu1 %v1785_v15  ;;  %617 = vmatpush1.bf16.msra.mxu0 %v1795_v17  ;;  %v2087_v28 = vrot.slane %v469_v26, %v473_v22  ;;  %v2091_v29 = vrot.slane %v469_v26, %v477_v23  ;;  %v1788_v31 = vld [vmem:[%s2367_s9 + $0x98] ss:$12 sps:$4 sm:$0xff]   ;;  %v1789_v34 = vld [vmem:[%s2367_s9 + $0xb0] ss:$12 sps:$4 sm:$0xff]   ;;  %v1808_v37 = vld [vmem:[%s2367_s9 + $0x94] ss:$12 sps:$4 sm:$0xff]  }
  0x39   :  { %1677 = vmatprep.subr.bf16.mxu1 %v1919_v8  ;;  %618 = vmatprep.subr.bf16.mxu0 %v1796_v18  ;;  %v1807_v36 = vld [vmem:[%s2367_s9 + $0x78] ss:$12 sps:$4 sm:$0xff]   ;;  %v1810_v39 = vld [vmem:[%s2367_s9 + $0x90] ss:$12 sps:$4 sm:$0xff]   ;;  %v1813_v41 = vld [vmem:[%s2367_s9 + $0xa8] ss:$12 sps:$4 sm:$0xff]  }
  0x3a   :  { %v1811_v40 = vld [vmem:[%s2367_s9 + $0xac] ss:$12 sps:$4 sm:$0xff]   ;;  %v1921_v42 = vmov 0   ;;  %v481_v43 = vsub.s32 2, %v2061_v19 }
  0x3b   :  { %646 = vmatprep.mubr.bf16.mxu0 %v1921_v42 }
  0x3c   :  { %1678 = vmatpush3.bf16.msra.mxu1 %v1786_v20  ;;  %619 = vmatpush1.bf16.msra.mxu0 %v1798_v21  ;;  %v482_v44 = vrot.slane %v469_v26, %v481_v43 }
  0x3d   :  { %1679 = vmatprep.subr.bf16.mxu1 %v1919_v8  ;;  %620 = vmatprep.subr.bf16.mxu0 %v1799_v24 }
  0x40   :  { %1680 = vmatpush3.bf16.msra.mxu1 %v1787_v25  ;;  %621 = vmatpush1.bf16.msra.mxu0 %v1801_v27 }
  0x41   :  { %1681 = vmatprep.subr.bf16.mxu1 %v1919_v8  ;;  %622 = vmatprep.subr.bf16.mxu0 %v1802_v30 }
  0x44   :  { %1682 = vmatpush3.bf16.msra.mxu1 %v1788_v31  ;;  %623 = vmatpush1.bf16.msra.mxu0 %v1804_v32 }
  0x45   :  { %1683 = vmatprep.subr.bf16.mxu1 %v1919_v8  ;;  %624 = vmatprep.subr.bf16.mxu0 %v1805_v33 }
  0x48   :  { %1684 = vmatpush3.bf16.msra.mxu1 %v1789_v34  ;;  %625 = vmatpush1.bf16.msra.mxu0 %v1807_v36 }
  0x49   :  { %626 = vmatprep.subr.bf16.mxu0 %v1808_v37 }
  0x4b   :  { %1686 = vmatmul.mubr.bf16.vlgmr.msra.gmra.mrb[0].mxu1 %v436_v38 }
  0x4c   :  { %627 = vmatpush1.bf16.msra.mxu0 %v1810_v39 }
  0x4d   :  { %628 = vmatprep.subr.bf16.mxu0 %v1811_v40 }
  0x50   :  { %629 = vmatpush1.bf16.msra.mxu0 %v1813_v41 }
  0x53   :  { %647 = vmatmul.mubr.bf16.vlgmr.msra.gmra.mrb[0].mxu0 %v436_v38 }
 0x11e   :  { %v689_v45 = vpop.f32.mrb[0].mxu1 }
 0x11f   :  { %v2136_v46 = vadd.f32 %v689_v45, %v482_v44  ;;  %v1687_v47 = vpop.f32.mrb[1].mxu1 }
 0x120   :  { %v692_v48 = vpop.f32.mrb[2].mxu1 }
 0x121   :  { %v1688_v49 = vpop.f32.mrb[3].mxu1 }
 0x122   :  { %1902 = dma.done.wait [#allocation6], 16 }
 0x123   :  { %1903 = vsyncadd [#allocation6], 4294967280 }
 0x124   :  { %1904 = dma.done.wait [#allocation6 + $0x1], 16 }
 0x125   :  { %1905 = vsyncadd [#allocation6 + $0x1], 4294967280 }
 0x126   :  { %1906 = dma.done.wait [#allocation6 + $0x2], 16 }
 0x127   :  { %1907 = vsyncadd [#allocation6 + $0x2], 4294967280 }
 0x128   :  { %1908 = dma.done.wait [#allocation6 + $0x3], 16 }
 0x129   :  { %1909 = vsyncadd [#allocation6 + $0x3], 4294967280 }
 0x12a   :  { %1910 = dma.done.wait [#allocation6 + $0x4], 16 }
 0x12b   :  { %1911 = vsyncadd [#allocation6 + $0x4], 4294967280 }
 0x12c   :  { %1912 = dma.done.wait [#allocation6 + $0x5], 16 }
 0x12d   :  { %1913 = vsyncadd [#allocation6 + $0x5], 4294967280 }
 0x12e   :  { %1914 = dma.done.wait [#allocation6 + $0x6], 16 }
 0x12f   :  { %1915 = vsyncadd [#allocation6 + $0x6], 4294967280 }
 0x130   :  { %1916 = dma.done.wait [#allocation6 + $0x7], 16 }
 0x131   :  { %1917 = vsyncadd [#allocation6 + $0x7], 4294967280  ;;  %1689 = vmatprep.subr.bf16.mxu0 %v1919_v8  ;;  %1709 = vmatprep.subr.bf16.mxu1 %v1919_v8  ;;  %v1816_v50 = vld [vmem:[%s2363_s5] sm:$0xff]   ;;  %v1818_v52 = vld [vmem:[%s2363_s5 + $0x8] sm:$0xff]   ;;  %vm1215_vm1 = vcmask 7168   ;;  %s2374_s21 = sld [smem:[#allocation26_spill]] }
 0x132   :  { %1705 = vmatprep.mubr.msk.bf16.mxu0 %vm1920_vm0, %v1919_v8  ;;  %1725 = vmatprep.mubr.msk.bf16.mxu1 %vm1920_vm0, %v1919_v8  ;;  %v1817_v51 = vld [vmem:[%s2362_s4] sm:$0xff]   ;;  %v1819_v53 = vld [vmem:[%s2362_s4 + $0x8] sm:$0xff]   ;;  %v1820_v54 = vld [vmem:[%s2363_s5 + $0x10] sm:$0xff]   ;;  %1217 = vst.msk [vmem:[#allocation5] sm:$0xff] %vm1215_vm1, %v1919_v8 }
 0x133   :  { %1814 = vset.pattern.permute.xlu0 %v1921_v42  ;;  %1815 = vset.pattern.permute.xlu1 %v1921_v42  ;;  %v1821_v55 = vld [vmem:[%s2362_s4 + $0x10] sm:$0xff]   ;;  %v1822_v56 = vld [vmem:[%s2363_s5 + $0x18] sm:$0xff]   ;;  %v1824_v58 = vld [vmem:[%s2363_s5 + $0x20] sm:$0xff]  }
 0x134   :  { %1690 = vmatpush3.bf16.msra.mxu0 %v1816_v50  ;;  %1710 = vmatpush3.bf16.msra.mxu1 %v1817_v51  ;;  %v1823_v57 = vld [vmem:[%s2362_s4 + $0x18] sm:$0xff]   ;;  %v1825_v59 = vld [vmem:[%s2362_s4 + $0x20] sm:$0xff]   ;;  %v1826_v60 = vld [vmem:[%s2363_s5 + $0x28] sm:$0xff]  }
 0x135   :  { %1691 = vmatprep.subr.bf16.mxu0 %v1919_v8  ;;  %1711 = vmatprep.subr.bf16.mxu1 %v1919_v8  ;;  %v1827_v61 = vld [vmem:[%s2362_s4 + $0x28] sm:$0xff]   ;;  %v1828_v62 = vld [vmem:[%s2363_s5 + $0x30] sm:$0xff]   ;;  %v1830_v0 = vld [vmem:[%s2363_s5 + $0x38] sm:$0xff]  }
 0x136   :  { %v1829_v63 = vld [vmem:[%s2362_s4 + $0x30] sm:$0xff]   ;;  %v1831_v1 = vld [vmem:[%s2362_s4 + $0x38] sm:$0xff]   ;;  %v730_v2 = vld [vmem:[%s2360_s2] sm:$0xff] }
 0x137   :  { %v712_v3 = vld [vmem:[#allocation2] sm:$0xff]  ;;  %v731_v5 = vpack.c.bf16 %v730_v2, %v730_v2  ;;  %v1835_v9 = vld [vmem:[%s2365_s7 + $0x8] ss:$12 sps:$4 sm:$0xff]   ;;  %v1840_v14 = vld [vmem:[%s2365_s7 + $0x30] ss:$12 sps:$4 sm:$0xff]  }
 0x138   :  { %1692 = vmatpush3.bf16.msra.mxu0 %v1818_v52  ;;  %1712 = vmatpush3.bf16.msra.mxu1 %v1819_v53  ;;  %v1834_v4 = vld [vmem:[%s2365_s7 + $0x4] ss:$12 sps:$4 sm:$0xff]   ;;  %v713_v6 = vpack.c.bf16 %v712_v3, %v712_v3  ;;  %v1832_v7 = vld [vmem:[%s2365_s7] ss:$12 sps:$4 sm:$0xff]   ;;  %v1838_v10 = vld [vmem:[%s2365_s7 + $0x1c] ss:$12 sps:$4 sm:$0xff]  }
 0x139   :  { %1693 = vmatprep.subr.bf16.mxu0 %v1919_v8  ;;  %1713 = vmatprep.subr.bf16.mxu1 %v1919_v8  ;;  %v1836_v11 = vld [vmem:[%s2365_s7 + $0x18] ss:$12 sps:$4 sm:$0xff]   ;;  %v1839_v12 = vld [vmem:[%s2365_s7 + $0x20] ss:$12 sps:$4 sm:$0xff]   ;;  %v1844_v17 = vld [vmem:[%s2365_s7 + $0x48] ss:$12 sps:$4 sm:$0xff]  }
 0x13a   :  { %v1842_v13 = vld [vmem:[%s2365_s7 + $0x34] ss:$12 sps:$4 sm:$0xff]   ;;  %v1843_v15 = vld [vmem:[%s2365_s7 + $0x38] ss:$12 sps:$4 sm:$0xff]   ;;  %v1847_v18 = vld [vmem:[%s2365_s7 + $0x50] ss:$12 sps:$4 sm:$0xff]  }
 0x13b   :  { %v1846_v16 = vld [vmem:[%s2365_s7 + $0x4c] ss:$12 sps:$4 sm:$0xff]   ;;  %v1850_v20 = vld [vmem:[%s2365_s7 + $0x64] ss:$12 sps:$4 sm:$0xff]   ;;  %v1851_v24 = vld [vmem:[%s2365_s7 + $0x68] ss:$12 sps:$4 sm:$0xff]  }
 0x13c   :  { %1694 = vmatpush3.bf16.msra.mxu0 %v1820_v54  ;;  %1714 = vmatpush3.bf16.msra.mxu1 %v1821_v55  ;;  %v1848_v21 = vld [vmem:[%s2365_s7 + $0x60] ss:$12 sps:$4 sm:$0xff]   ;;  %v1854_v25 = vld [vmem:[%s2365_s7 + $0x7c] ss:$12 sps:$4 sm:$0xff]   ;;  %v1852_v26 = vld [vmem:[%s2365_s7 + $0x78] ss:$12 sps:$4 sm:$0xff]  }
 0x13d   :  { %1695 = vmatprep.subr.bf16.mxu0 %v1919_v8  ;;  %1715 = vmatprep.subr.bf16.mxu1 %v1919_v8  ;;  %v1855_v27 = vld [vmem:[%s2365_s7 + $0x80] ss:$12 sps:$4 sm:$0xff]   ;;  %v1856_v31 = vld [vmem:[%s2365_s7 + $0x90] ss:$12 sps:$4 sm:$0xff]   ;;  %v1859_v32 = vld [vmem:[%s2365_s7 + $0x98] ss:$12 sps:$4 sm:$0xff]  }
 0x13e   :  { %v1858_v30 = vld [vmem:[%s2365_s7 + $0x94] ss:$12 sps:$4 sm:$0xff]   ;;  %v1862_v33 = vld [vmem:[%s2365_s7 + $0xac] ss:$12 sps:$4 sm:$0xff]   ;;  %v1863_v36 = vld [vmem:[%s2365_s7 + $0xb0] ss:$12 sps:$4 sm:$0xff]  }
 0x13f   :  { %v1860_v34 = vld [vmem:[%s2365_s7 + $0xa8] ss:$12 sps:$4 sm:$0xff]   ;;  %v1580_v39 = vld [vmem:[%s2364_s6] ss:$0 sm:$0xff]  ;;  %v1867_v54 = vld [vmem:[%s2369_s11 + $0x18] sm:$0xff]  }
 0x140   :  { %1696 = vmatpush3.bf16.msra.mxu0 %v1822_v56  ;;  %1716 = vmatpush3.bf16.msra.mxu1 %v1823_v57  ;;  %v1864_v51 = vld [vmem:[%s2369_s11] sm:$0xff]   ;;  %v1865_v52 = vld [vmem:[%s2369_s11 + $0x8] sm:$0xff]   ;;  %v1866_v53 = vld [vmem:[%s2369_s11 + $0x10] sm:$0xff]  }
 0x141   :  { %1697 = vmatprep.subr.bf16.mxu0 %v1919_v8  ;;  %1717 = vmatprep.subr.bf16.mxu1 %v1919_v8  ;;  %v1868_v55 = vld [vmem:[%s2369_s11 + $0x20] sm:$0xff]   ;;  %v1869_v56 = vld [vmem:[%s2369_s11 + $0x28] sm:$0xff]   ;;  %v1870_v57 = vld [vmem:[%s2369_s11 + $0x30] sm:$0xff]  }
 0x144   :  { %1698 = vmatpush3.bf16.msra.mxu0 %v1824_v58  ;;  %1718 = vmatpush3.bf16.msra.mxu1 %v1825_v59  ;;  %v1871_v58 = vld [vmem:[%s2369_s11 + $0x38] sm:$0xff]   ;;  %v965_v59 = vld [vmem:[%s2366_s8] sm:$0x7] }
 0x145   :  { %1699 = vmatprep.subr.bf16.mxu0 %v1919_v8  ;;  %1719 = vmatprep.subr.bf16.mxu1 %v1919_v8 }
 0x148   :  { %1700 = vmatpush3.bf16.msra.mxu0 %v1826_v60  ;;  %1720 = vmatpush3.bf16.msra.mxu1 %v1827_v61  ;;  %v970_v60 = vrot.slane %v965_v59, %v473_v22  ;;  %v974_v61 = vrot.slane %v965_v59, %v477_v23 }
 0x149   :  { %1701 = vmatprep.subr.bf16.mxu0 %v1919_v8  ;;  %1721 = vmatprep.subr.bf16.mxu1 %v1919_v8 }
 0x14c   :  { %1702 = vmatpush3.bf16.msra.mxu0 %v1828_v62  ;;  %1722 = vmatpush3.bf16.msra.mxu1 %v1829_v63  ;;  %v1769_v62 = vadd.f32 %v970_v60, %v2087_v28 }
 0x14d   :  { %1703 = vmatprep.subr.bf16.mxu0 %v1919_v8  ;;  %1723 = vmatprep.subr.bf16.mxu1 %v1919_v8 }
 0x150   :  { %1704 = vmatpush3.bf16.msra.mxu0 %v1830_v0  ;;  %1724 = vmatpush3.bf16.msra.mxu1 %v1831_v1  ;;  %v1771_v1 = vadd.f32 %v974_v61, %v2091_v29 }
 0x151   :  { %1110 = vmatprep.subr.bf16.mxu0 %v1834_v4  ;;  %1729 = vmatprep.subr.bf16.mxu1 %v1919_v8 }
 0x153   :  { %1706 = vmatmul.mubr.bf16.vlgmr.msra.gmra.mrb[4].mxu0 %v731_v5  ;;  %1726 = vmatmul.mubr.bf16.vlgmr.msra.gmra.mrb[4].mxu1 %v713_v6 }
 0x154   :  { %1111 = vmatpush1.bf16.msra.mxu0 %v1832_v7  ;;  %1730 = vmatpush3.bf16.msra.mxu1 %v1835_v9 }
 0x155   :  { %1112 = vmatprep.subr.bf16.mxu0 %v1838_v10  ;;  %1731 = vmatprep.subr.bf16.mxu1 %v1919_v8 }
 0x156   :  { %1142 = vmatprep.mubr.bf16.mxu0 %v1921_v42  ;;  %1745 = vmatprep.mubr.msk.bf16.mxu1 %vm1920_vm0, %v1919_v8 }
 0x158   :  { %1113 = vmatpush1.bf16.msra.mxu0 %v1836_v11  ;;  %1732 = vmatpush3.bf16.msra.mxu1 %v1839_v12 }
 0x159   :  { %1114 = vmatprep.subr.bf16.mxu0 %v1842_v13  ;;  %1733 = vmatprep.subr.bf16.mxu1 %v1919_v8  ;;  %v978_v13 = vrot.slane %v965_v59, %v481_v43 }
 0x15c   :  { %1115 = vmatpush1.bf16.msra.mxu0 %v1840_v14  ;;  %1734 = vmatpush3.bf16.msra.mxu1 %v1843_v15 }
 0x15d   :  { %1116 = vmatprep.subr.bf16.mxu0 %v1846_v16  ;;  %1735 = vmatprep.subr.bf16.mxu1 %v1919_v8 }
 0x160   :  { %1117 = vmatpush1.bf16.msra.mxu0 %v1844_v17  ;;  %1736 = vmatpush3.bf16.msra.mxu1 %v1847_v18 }
 0x161   :  { %1118 = vmatprep.subr.bf16.mxu0 %v1850_v20  ;;  %1737 = vmatprep.subr.bf16.mxu1 %v1919_v8 }
 0x164   :  { %1119 = vmatpush1.bf16.msra.mxu0 %v1848_v21  ;;  %1738 = vmatpush3.bf16.msra.mxu1 %v1851_v24 }
 0x165   :  { %1120 = vmatprep.subr.bf16.mxu0 %v1854_v25  ;;  %1739 = vmatprep.subr.bf16.mxu1 %v1919_v8 }
 0x168   :  { %1121 = vmatpush1.bf16.msra.mxu0 %v1852_v26  ;;  %1740 = vmatpush3.bf16.msra.mxu1 %v1855_v27 }
 0x169   :  { %1122 = vmatprep.subr.bf16.mxu0 %v1858_v30  ;;  %1741 = vmatprep.subr.bf16.mxu1 %v1919_v8 }
 0x16c   :  { %1123 = vmatpush1.bf16.msra.mxu0 %v1856_v31  ;;  %1742 = vmatpush3.bf16.msra.mxu1 %v1859_v32 }
 0x16d   :  { %1743 = vmatprep.subr.bf16.mxu1 %v1919_v8  ;;  %1124 = vmatprep.subr.bf16.mxu0 %v1862_v33 }
 0x170   :  { %1125 = vmatpush1.bf16.msra.mxu0 %v1860_v34  ;;  %1744 = vmatpush3.bf16.msra.mxu1 %v1863_v36 }
 0x171   :  { %1749 = vmatprep.subr.bf16.mxu0 %v1919_v8 }
 0x226   :  { %v830_v37 = vpop.f32.mrb[4].mxu0  ;;  %v918_v38 = vpop.f32.mrb[4].mxu1 }
 0x227   :  { %v1707_v40 = vpop.f32.mrb[5].mxu0  ;;  %v919_v41 = vadd.f32 %v918_v38, %v830_v37  ;;  %v1727_v42 = vpop.f32.mrb[5].mxu1 }
 0x228   :  { %v833_v44 = vpop.f32.mrb[6].mxu0  ;;  %v921_v45 = vpop.f32.mrb[6].mxu1 }
 0x229   :  { %v1708_v47 = vpop.f32.mrb[7].mxu0  ;;  %v931_v48 = vadd.f32 %v1580_v39, %v919_v41  ;;  %v1728_v49 = vpop.f32.mrb[7].mxu1  ;;  %v1339_v45 = vld [vmem:[#allocation5] sm:$0xff] }
 0x22b   :  { %v932_v50 = vpack.c.bf16 %v931_v48, %v931_v48 }
 0x22d   :  { %1143 = vmatmul.mubr.bf16.vlgmr.msra.gmra.mrb[0].mxu0 %v932_v50  ;;  %1746 = vmatmul.mubr.bf16.vlgmr.msra.gmra.mrb[8].mxu1 %v932_v50 }
 0x22e   :  { %1765 = vmatprep.mubr.msk.bf16.mxu0 %vm1920_vm0, %v1919_v8  ;;  %1750 = vmatpush3.bf16.msra.mxu0 %v1864_v51 }
 0x22f   :  { %1751 = vmatprep.subr.bf16.mxu0 %v1919_v8 }
 0x232   :  { %1752 = vmatpush3.bf16.msra.mxu0 %v1865_v52 }
 0x233   :  { %1753 = vmatprep.subr.bf16.mxu0 %v1919_v8 }
 0x236   :  { %1754 = vmatpush3.bf16.msra.mxu0 %v1866_v53 }
 0x237   :  { %1755 = vmatprep.subr.bf16.mxu0 %v1919_v8 }
 0x23a   :  { %1756 = vmatpush3.bf16.msra.mxu0 %v1867_v54 }
 0x23b   :  { %1757 = vmatprep.subr.bf16.mxu0 %v1919_v8 }
 0x23e   :  { %1758 = vmatpush3.bf16.msra.mxu0 %v1868_v55 }
 0x23f   :  { %1759 = vmatprep.subr.bf16.mxu0 %v1919_v8 }
 0x242   :  { %1760 = vmatpush3.bf16.msra.mxu0 %v1869_v56 }
 0x243   :  { %1761 = vmatprep.subr.bf16.mxu0 %v1919_v8 }
 0x246   :  { %1762 = vmatpush3.bf16.msra.mxu0 %v1870_v57 }
 0x247   :  { %1763 = vmatprep.subr.bf16.mxu0 %v1919_v8 }
 0x24a   :  { %1764 = vmatpush3.bf16.msra.mxu0 %v1871_v58 }
 0x300   :  { %v1144_v63 = vpop.f32.mrb[0].mxu0  ;;  %v1185_v0 = vpop.f32.mrb[8].mxu1 }
 0x301   :  { %v1770_v2 = vadd.f32 %v1769_v62, %v1144_v63  ;;  %v1146_v3 = vpop.f32.mrb[1].mxu0  ;;  %v1747_v4 = vpop.f32.mrb[9].mxu1  ;;  %v1186_v15 = vadd.f32 %v1185_v0, %v978_v13 }
 0x302   :  { %v1148_v5 = vpop.f32.mrb[2].mxu0  ;;  %v1188_v6 = vpop.f32.mrb[10].mxu1  ;;  %v1772_v11 = vadd.f32 %v1771_v1, %v1146_v3 }
 0x303   :  { %v1605_v7 = vmul.f32 -1.442695, %v1770_v2  ;;  %v1149_v9 = vpop.f32.mrb[3].mxu0  ;;  %v1748_v10 = vpop.f32.mrb[11].mxu1 }
 0x304   :  { %v1606_v22 = vmul.f32 -1.442695, %v1772_v11 }
 0x305   :  { %1872 = vpow2.f32 %v1605_v7 }
 0x306   :  { %1874 = vpow2.f32 %v1606_v22 }
 0x30f   :  { %v1873_v12 = vpop.eup %1872 }
 0x310   :  { %v1195_v23 = vadd.f32 1.0, %v1873_v12  ;;  %v1875_v28 = vpop.eup %1874 }
 0x311   :  { %v1202_v29 = vadd.f32 1.0, %v1875_v28 }
 0x312   :  { %1876 = vrcp.f32 %v1195_v23 }
 0x313   :  { %1878 = vrcp.f32 %v1202_v29 }
 0x31c   :  { %v1877_v14 = vpop.eup %1876 }
 0x31d   :  { %v1205_v16 = vmul.f32 %v1877_v14, %v2136_v46  ;;  %v1879_v18 = vpop.eup %1878  ;;  %v1922_v46 = vmov -inf  }
 0x31e   :  { %v1208_v20 = vsub.f32 1.0, %v1879_v18  ;;  %v1210_v25 = vmul.f32 %v1879_v18, %v2112_v35  ;;  %1216 = vst.msk [vmem:[#allocation4] sm:$0xff] %vm1215_vm1, %v1922_v46  ;;  %v1607_v35 = vld [vmem:[%s2370_s12] ss:$0 sm:$0xff] }
 0x31f   :  { %v1206_v17 = vadd.f32 %v1205_v16, %v1186_v15 }
 0x321   :  { %1880 = vtanh.f32 %v1206_v17 }
 0x325   :  { %v1335_v34 = vld [vmem:[#allocation4] sm:$0xff] }
 0x32b   :  { %v1881_v21 = vpop.eup %1880 }
 0x32c   :  { %v1209_v24 = vmul.f32 %v1881_v21, %v1208_v20 }
 0x32e   :  { %v1211_v26 = vadd.f32 %v1210_v25, %v1209_v24 }
 0x330   :  { %1212 = vst [vmem:[%s2372_s14] sm:$0xff] %v1211_v26  ;;  %v1213_v19 = vpack.c.bf16 %v1211_v26, %v1211_v26 }
 0x332   :  { %1214 = vst [vmem:[#allocation3] sm:$0xf] %v1213_v19 }
 0x339   :  { %v1218_v43 = vld [vmem:[#allocation3] sm:$0xf] }
 0x33a   :  { %1766 = vmatmul.mubr.bf16.vlgmr.msra.gmra.mrb[8].mxu0 %v1218_v43 }
 0x40d   :  { %v1324_v27 = vpop.f32.mrb[8].mxu0 }
 0x40e   :  { %v1325_v30 = vadd.f32 %v1607_v35, %v1324_v27  ;;  %v1767_v31 = vpop.f32.mrb[9].mxu0 }
 0x40f   :  { %v1327_v32 = vpop.f32.mrb[10].mxu0 }
 0x410   :  { %1336 = vmax.xlane.f32.xlu0 %v1325_v30  ;;  %v1768_v33 = vpop.f32.mrb[11].mxu0 }
 0x49d   :  { %v1337_v36 = vpop.xlane.xlu0 %1336 }
 0x49e   :  { %v1338_v37 = vmax.f32 %v1335_v34, %v1337_v36 }
 0x4a0   :  { %v1340_v38 = vsub.f32 %v1335_v34, %v1338_v37  ;;  %1357 = vst.msk [vmem:[#allocation4] sm:$0xff] %vm1215_vm1, %v1338_v37  ;;  %1346 = vperm.xlu0 %1814, %v1338_v37  }
 0x4a2   :  { %v1341_v42 = vmul.f32 1.442695, %v1340_v38 }
 0x4a7   :  { %v1361_v53 = vld [vmem:[#allocation4] sm:$0xff] }
 0x51f   :  { %v1347_v39 = vpop.permute.xlu0 %1346 }
 0x520   :  { %v1349_v40 = vsub.f32 %v1325_v30, %v1347_v39 }
 0x522   :  { %v1350_v8 = vmul.f32 1.442695, %v1349_v40 }
 0x524   :  { %1882 = vpow2.f32 %v1350_v8 }
 0x525   :  { %1884 = vpow2.f32 %v1341_v42 }
 0x52e   :  { %v1883_v41 = vpop.eup %1882 }
 0x52f   :  { %1352 = vadd.xlane.f32.xlu1 %v1883_v41  ;;  %v1885_v44 = vpop.eup %1884 }
 0x530   :  { %v1343_v47 = vmul.f32 %v1885_v44, %v1339_v45 }
 0x5bc   :  { %v1353_v48 = vpop.xlane.xlu1 %1352 }
 0x5bd   :  { %v1354_v49 = vadd.f32 %v1353_v48, %v1343_v47 }
 0x5bf   :  { %1356 = vst.msk [vmem:[#allocation5] sm:$0xff] %vm1215_vm1, %v1354_v49 }
 0x5c6   :  { %v1362_v50 = vld [vmem:[#allocation5] sm:$0xff] }
 0x5c7   :  { %1886 = vlog2.f32 %v1362_v50 }
 0x5d1   :  { %v1887_v51 = vpop.eup %1886 }
 0x5d2   :  { %v1364_v52 = vmul.f32 0.6931472, %v1887_v51 }
 0x5d4   :  { %v1365_v54 = vadd.f32 %v1364_v52, %v1361_v53 }
 0x5d6   :  { %1369 = vperm.xlu1 %1815, %v1365_v54  }
 0x655   :  { %v1370_v55 = vpop.permute.xlu1 %1369 }
 0x656   :  { %v1372_v56 = vsub.f32 %v1325_v30, %v1370_v55 }
 0x658   :  { %1373 = vst [vmem:[%s2374_s21] sm:$0xff] %v1372_v56 }
 0x659   :  { %1382 = vsyncmov [#allocation6] }
 0x65c   :  { %s1383_s15 = vpop.sfrf %1382 }
 0x65d   :  { %p1616_p5 = scmp.ne.s32.totalorder %s1383_s15, 0 }
 0x65f   :  { %1387 = shalt.err (%p1616_p5)  }
 0x660   :  { %1389 = vsyncmov [#allocation6 + $0x1] }
 0x663   :  { %s1390_s22 = vpop.sfrf %1389 }
 0x664   :  { %p1617_p6 = scmp.ne.s32.totalorder %s1390_s22, 0 }
 0x666   :  { %1394 = shalt.err (%p1617_p6)  }
 0x667   :  { %1396 = vsyncmov [#allocation6 + $0x2] }
 0x66a   :  { %s1397_s16 = vpop.sfrf %1396 }
 0x66b   :  { %p1618_p7 = scmp.ne.s32.totalorder %s1397_s16, 0 }
 0x66d   :  { %1401 = shalt.err (%p1618_p7)  }
 0x66e   :  { %1403 = vsyncmov [#allocation6 + $0x3] }
 0x671   :  { %s1404_s23 = vpop.sfrf %1403 }
 0x672   :  { %p1619_p8 = scmp.ne.s32.totalorder %s1404_s23, 0 }
 0x674   :  { %1408 = shalt.err (%p1619_p8)  }
 0x675   :  { %1410 = vsyncmov [#allocation6 + $0x4] }
 0x678   :  { %s1411_s17 = vpop.sfrf %1410 }
 0x679   :  { %p1620_p9 = scmp.ne.s32.totalorder %s1411_s17, 0 }
 0x67b   :  { %1415 = shalt.err (%p1620_p9)  }
 0x67c   :  { %1417 = vsyncmov [#allocation6 + $0x5] }
 0x67f   :  { %s1418_s0 = vpop.sfrf %1417 }
 0x680   :  { %p1621_p10 = scmp.ne.s32.totalorder %s1418_s0, 0 }
 0x682   :  { %1422 = shalt.err (%p1621_p10)  }
 0x683   :  { %1424 = vsyncmov [#allocation6 + $0x6] }
 0x686   :  { %s1425_s7 = vpop.sfrf %1424 }
 0x687   :  { %p1622_p11 = scmp.ne.s32.totalorder %s1425_s7, 0 }
 0x689   :  { %1429 = shalt.err (%p1622_p11)  }
 0x68a   :  { %1431 = vsyncmov [#allocation6 + $0x7] }
 0x68d   :  { %s1432_s25 = vpop.sfrf %1431 }
 0x68e   :  { %p1623_p12 = scmp.ne.s32.totalorder %s1432_s25, 0 }
 0x690   :  { %1436 = shalt.err (%p1623_p12)  }

</bundles_post_ra>
